<compile_context>
chip_gen: v7x
topology: tpu7x:2x2x1
jax: 0.10.0
libtpu: 0.0.40
codegen_flags: <defaults>
</compile_context>

<pallas_src>
import functools
import math

import jax
import jax.numpy as jnp
from jax.experimental import pallas as pl
from jax.experimental.pallas import tpu as pltpu


def _round_up(n, m):
    return ((n + m - 1) // m) * m


def _double_conv_kernel(x_ref, w1_ref, g1_ref, b1_ref, w2_ref, g2_ref, b2_ref,
                        mask_ref, o_ref, *, npix, wp, hw, residual):
    """One sample per grid step, channels-on-sublanes / padded-pixels-on-lanes layout.

    x_ref:    (1, Cin_k, npix + 2*guard) bf16  spatially padded, flattened, guard columns
    w1_ref:   (9, Cmid, Cin_k)  bf16           per-tap transposed conv1 weights
    w2_ref:   (9, Cout, Cmid_k) bf16           per-tap transposed conv2 weights
    g*/b*:    (C, 1) f32                       GroupNorm affine (lane-broadcast)
    mask_ref: (1, npix) f32                    1.0 at interior pixels, 0.0 on the halo ring
    o_ref:    (1, Cout, npix)                  lane-dense output slab (wrapper crops halo)
    """
    guard = wp + 1
    Cmid = w1_ref.shape[1]
    Cout, Cmid_k = w2_ref.shape[1], w2_ref.shape[2]
    inv_sqrt2 = jnp.float32(1.0 / math.sqrt(2.0))

    mask = mask_ref[...]                                   # (1, npix) f32
    xg = x_ref[0]                                          # (Cin_k, npix + 2*guard) bf16

    def conv3x3(src, w_ref):
        # 9 accumulating per-tap matmuls on lane-shifted views (no materialized im2col).
        # Output positions live on the same flattened padded grid; halo outputs are garbage
        # and are masked / cropped downstream.
        acc = None
        t = 0
        for dy in (-1, 0, 1):
            for dx in (-1, 0, 1):
                start = guard + dy * wp + dx               # static lane offset
                rhs = src[:, start:start + npix]           # (K, npix) bf16, lane shift only
                part = jnp.dot(w_ref[t], rhs, preferred_element_type=jnp.float32)
                acc = part if acc is None else acc + part
                t += 1
        return acc                                         # (Cout_w, npix) f32

    def group_norm(h, g_ref, b_ref, c):
        # GroupNorm(num_groups=1): stats over interior pixels only (mask kills halo garbage),
        # two-pass mean/variance in f32. eps = 1e-5 (PyTorch default).
        n = jnp.float32(c * hw)
        mu = jnp.sum(h * mask) / n
        d = (h - mu) * mask
        var = jnp.sum(d * d) / n
        hn = (h - mu) * jax.lax.rsqrt(var + jnp.float32(1e-5))
        return hn * g_ref[...] + b_ref[...]                # (C,1) affine, lane broadcast

    def gelu(h):
        # erf-based GELU (matches torch.nn.functional.gelu default)
        return 0.5 * h * (1.0 + jax.lax.erf(h * inv_sqrt2))

    # conv1 -> GN -> GELU (all lane-dense)
    h1 = conv3x3(xg, w1_ref)                               # (Cmid, npix) f32
    h1 = gelu(group_norm(h1, g1_ref, b1_ref, Cmid))
    # Re-zero halo positions (they are conv2's zero padding) and cast once for the MXU.
    h1 = (h1 * mask).astype(jnp.bfloat16)
    if Cmid_k > Cmid:                                      # K-pad rows for conv2 (rare)
        h1 = jnp.concatenate(
            [h1, jnp.zeros((Cmid_k - Cmid, npix), jnp.bfloat16)], axis=0)
    zg = jnp.zeros((Cmid_k, guard), jnp.bfloat16)
    h1g = jnp.concatenate([zg, h1, zg], axis=1)            # guarded slab for conv2 taps

    # conv2 -> GN (-> residual + GELU)
    h2 = conv3x3(h1g, w2_ref)                              # (Cout, npix) f32
    h2 = group_norm(h2, g2_ref, b2_ref, Cout)
    if residual:
        # Cin == Cout enforced in the wrapper; x is bf16 here (same feed as conv1),
        # rounding ~2^-9 relative -- well inside test tolerance.
        x_center = xg[0:Cout, guard:guard + npix].astype(jnp.float32)
        h2 = gelu(h2 + x_center)

    # Lane-dense store of the full padded slab; wrapper crops the 1-pixel halo.
    o_ref[0] = h2.astype(o_ref.dtype)


def double_conv(x_nchw, w1, g1, b1, w2, g2, b2, *, residual=False):
    """x_nchw: (B, Cin, H, W); w1: (3,3,Cin,Cmid) HWIO; w2: (3,3,Cmid,Cout) HWIO."""
    B, Cin, H, W = x_nchw.shape
    Cmid, Cout = w1.shape[3], w2.shape[3]
    if residual and Cin != Cout:
        raise ValueError(
            f"residual=True requires in_channels == out_channels, got {Cin} vs {Cout}")

    Hp, Wp = H + 2, W + 2
    npix = Hp * Wp
    guard = Wp + 1                                         # max |tap shift| in flat coords
    Cin_k = _round_up(Cin, 8)                              # K dims padded to sublane quantum
    Cmid_k = _round_up(Cmid, 8)

    # Conv weights: HWIO (3,3,ci,co) -> per-tap transposed (9, co, ci_padded) bf16.
    w1t = jnp.transpose(w1, (0, 1, 3, 2)).reshape(9, Cmid, Cin)
    w1t = jnp.pad(w1t, ((0, 0), (0, 0), (0, Cin_k - Cin))).astype(jnp.bfloat16)
    w2t = jnp.transpose(w2, (0, 1, 3, 2)).reshape(9, Cout, Cmid)
    w2t = jnp.pad(w2t, ((0, 0), (0, 0), (0, Cmid_k - Cmid))).astype(jnp.bfloat16)

    g1c = g1.reshape(Cmid, 1).astype(jnp.float32)
    b1c = b1.reshape(Cmid, 1).astype(jnp.float32)
    g2c = g2.reshape(Cout, 1).astype(jnp.float32)
    b2c = b2.reshape(Cout, 1).astype(jnp.float32)

    # Interior mask over the flattened padded grid (1 = real pixel, 0 = halo ring).
    mask = jnp.zeros((Hp, Wp), jnp.float32).at[1:H + 1, 1:W + 1].set(1.0).reshape(1, npix)

    # x: NCHW -> zero-pad (SAME conv halo) + channel K-pad -> flatten -> guard columns -> bf16.
    xp = jnp.pad(x_nchw, ((0, 0), (0, Cin_k - Cin), (1, 1), (1, 1)))
    xg = jnp.pad(xp.reshape(B, Cin_k, npix),
                 ((0, 0), (0, 0), (guard, guard))).astype(jnp.bfloat16)

    # Explicit VMEM budget: double-buffered in/out blocks + weights + f32 intermediates.
    itemsize = jnp.dtype(x_nchw.dtype).itemsize
    est = (2 * Cin_k * (npix + 2 * guard) * 2            # input block x2 (bf16)
           + 2 * Cout * npix * itemsize                  # output block x2
           + (9 * Cmid * Cin_k + 9 * Cout * Cmid_k) * 2  # weights (bf16)
           + 8 * max(Cmid_k, Cout) * npix * 4            # f32 intermediates (headroom)
           + npix * 4)                                   # mask
    vmem_limit = int(min(max(2 * est, 32 * 1024 * 1024), 64 * 1024 * 1024))

    kernel = functools.partial(_double_conv_kernel, npix=npix, wp=Wp, hw=H * W,
                               residual=residual)
    out = pl.pallas_call(
        kernel,
        out_shape=jax.ShapeDtypeStruct((B, Cout, npix), x_nchw.dtype),
        grid=(B,),
        in_specs=[
            pl.BlockSpec((1, Cin_k, npix + 2 * guard), lambda b: (b, 0, 0)),
            pl.BlockSpec((9, Cmid, Cin_k), lambda b: (0, 0, 0)),
            pl.BlockSpec((Cmid, 1), lambda b: (0, 0)),
            pl.BlockSpec((Cmid, 1), lambda b: (0, 0)),
            pl.BlockSpec((9, Cout, Cmid_k), lambda b: (0, 0, 0)),
            pl.BlockSpec((Cout, 1), lambda b: (0, 0)),
            pl.BlockSpec((Cout, 1), lambda b: (0, 0)),
            pl.BlockSpec((1, npix), lambda b: (0, 0)),
        ],
        out_specs=pl.BlockSpec((1, Cout, npix), lambda b: (b, 0, 0)),
        compiler_params=pltpu.CompilerParams(
            dimension_semantics=("parallel",),
            vmem_limit_bytes=vmem_limit),
    )(xg, w1t, g1c, b1c, w2t, g2c, b2c, mask)

    # Crop the halo ring; layout is already NCHW.
    return out.reshape(B, Cout, Hp, Wp)[:, :, 1:H + 1, 1:W + 1]


# ------------------------- pure-JAX reference (f32) -------------------------
def _ref_double_conv(x_nchw, w1, g1, b1, w2, g2, b2, *, residual=False):
    x = jnp.transpose(x_nchw, (0, 2, 3, 1))
    dn = ("NHWC", "HWIO", "NHWC")

    def conv(h, w):
        return jax.lax.conv_general_dilated(h, w, (1, 1), "SAME",
                                            dimension_numbers=dn)

    def gn(h, g, b):
        mu = jnp.mean(h, axis=(1, 2, 3), keepdims=True)
        var = jnp.mean((h - mu) ** 2, axis=(1, 2, 3), keepdims=True)
        return (h - mu) / jnp.sqrt(var + 1e-5) * g + b

    h = conv(x, w1)
    h = gn(h, g1, b1)
    h = jax.nn.gelu(h, approximate=False)
    h = conv(h, w2)
    h = gn(h, g2, b2)
    if residual:
        h = jax.nn.gelu(x + h, approximate=False)
    return jnp.transpose(h, (0, 3, 1, 2))


def _make_params(key, cin, cmid, cout):
    k1, k2 = jax.random.split(key)
    w1 = 0.1 * jax.random.normal(k1, (3, 3, cin, cmid), jnp.float32)
    w2 = 0.1 * jax.random.normal(k2, (3, 3, cmid, cout), jnp.float32)
    # GroupNorm affine at PyTorch init: weight=1, bias=0
    g1, b1 = jnp.ones((cmid,), jnp.float32), jnp.zeros((cmid,), jnp.float32)
    g2, b2 = jnp.ones((cout,), jnp.float32), jnp.zeros((cout,), jnp.float32)
    return w1, g1, b1, w2, g2, b2


if __name__ == "__main__":
    key = jax.random.PRNGKey(0)
    kx, kp1, kp2 = jax.random.split(key, 3)

    # Conv matmuls run in bf16 on the MXU; GroupNorm stats / GELU / residual stay f32, so
    # compare to the f32 reference at bf16-level tolerance.
    TOL = 3e-2

    # non-residual: DoubleConv(in=4, out=8)
    x = jax.random.normal(kx, (2, 4, 16, 16), jnp.float32)
    p = _make_params(kp1, 4, 8, 8)
    y = double_conv(x, *p, residual=False)
    jax.block_until_ready(y)
    y_ref = _ref_double_conv(x, *p, residual=False)
    assert y.shape == (2, 8, 16, 16)
    assert jnp.allclose(y, y_ref, atol=TOL, rtol=TOL)

    # residual: DoubleConv(in=4, out=4, residual=True)
    pr = _make_params(kp2, 4, 4, 4)
    yr = double_conv(x, *pr, residual=True)
    jax.block_until_ready(yr)
    yr_ref = _ref_double_conv(x, *pr, residual=True)
    assert yr.shape == (2, 4, 16, 16)
    assert jnp.allclose(yr, yr_ref, atol=TOL, rtol=TOL)

    print("KERNEL_OK")
</pallas_src>

<mosaic_0001>
module attributes {stable_mosaic.version = 11 : i64} {
  func.func @_double_conv_kernel(%arg0: i32, %arg1: memref<1x8x362xbf16, #tpu.memory_space<vmem>>, %arg2: memref<9x8x8xbf16, #tpu.memory_space<vmem>>, %arg3: memref<8x1xf32, #tpu.memory_space<vmem>>, %arg4: memref<8x1xf32, #tpu.memory_space<vmem>>, %arg5: memref<9x8x8xbf16, #tpu.memory_space<vmem>>, %arg6: memref<8x1xf32, #tpu.memory_space<vmem>>, %arg7: memref<8x1xf32, #tpu.memory_space<vmem>>, %arg8: memref<1x324xf32, #tpu.memory_space<vmem>>, %arg9: memref<1x8x324xf32, #tpu.memory_space<vmem>>) attributes {dimension_semantics = [#tpu.dimension_semantics<parallel>], iteration_bounds = array<i64: 2>, scalar_prefetch = 0 : i64, scratch_operands = 0 : i64, tpu.core_type = #tpu.core_type<tc>, window_params = [{transform_indices = @transform_0, window_bounds = array<i64: 1, 8, 362>}, {pipeline_mode = #tpu.pipeline_mode<synchronous>, transform_indices = @transform_1, window_bounds = array<i64: 9, 8, 8>}, {pipeline_mode = #tpu.pipeline_mode<synchronous>, transform_indices = @transform_2, window_bounds = array<i64: 8, 1>}, {pipeline_mode = #tpu.pipeline_mode<synchronous>, transform_indices = @transform_3, window_bounds = array<i64: 8, 1>}, {pipeline_mode = #tpu.pipeline_mode<synchronous>, transform_indices = @transform_4, window_bounds = array<i64: 9, 8, 8>}, {pipeline_mode = #tpu.pipeline_mode<synchronous>, transform_indices = @transform_5, window_bounds = array<i64: 8, 1>}, {pipeline_mode = #tpu.pipeline_mode<synchronous>, transform_indices = @transform_6, window_bounds = array<i64: 8, 1>}, {pipeline_mode = #tpu.pipeline_mode<synchronous>, transform_indices = @transform_7, window_bounds = array<i64: 1, 324>}, {transform_indices = @transform_8, window_bounds = array<i64: 1, 8, 324>}]} {
    %c0 = arith.constant 0 : index
    %c0_0 = arith.constant 0 : index
    %0 = vector.load %arg8[%c0, %c0_0] : memref<1x324xf32, #tpu.memory_space<vmem>>, vector<1x324xf32>
    %c0_1 = arith.constant 0 : index
    %c0_2 = arith.constant 0 : index
    %c0_3 = arith.constant 0 : index
    %1 = vector.load %arg1[%c0_1, %c0_2, %c0_3] : memref<1x8x362xbf16, #tpu.memory_space<vmem>>, vector<1x8x362xbf16>
    %2 = vector.shape_cast %1 : vector<1x8x362xbf16> to vector<8x362xbf16>
    %3 = vector.extract_strided_slice %2 {offsets = [0, 0], sizes = [8, 324], strides = [1, 1]} : vector<8x362xbf16> to vector<8x324xbf16>
    %c0_4 = arith.constant 0 : index
    %c0_5 = arith.constant 0 : index
    %c0_6 = arith.constant 0 : index
    %4 = vector.load %arg2[%c0_4, %c0_5, %c0_6] : memref<9x8x8xbf16, #tpu.memory_space<vmem>>, vector<1x8x8xbf16>
    %5 = vector.shape_cast %4 : vector<1x8x8xbf16> to vector<8x8xbf16>
    %cst = arith.constant dense<0.000000e+00> : vector<8x324xf32>
    %6 = tpu.matmul %5, %3, %cst {dimension_numbers = #tpu.dot_dimension_numbers<[1], [0], [0], [1], [0, 0, 1, 1], [], []>} : vector<8x8xbf16>, vector<8x324xbf16>, vector<8x324xf32> -> vector<8x324xf32>
    %7 = vector.extract_strided_slice %2 {offsets = [0, 1], sizes = [8, 324], strides = [1, 1]} : vector<8x362xbf16> to vector<8x324xbf16>
    %c1 = arith.constant 1 : index
    %c0_7 = arith.constant 0 : index
    %c0_8 = arith.constant 0 : index
    %8 = vector.load %arg2[%c1, %c0_7, %c0_8] : memref<9x8x8xbf16, #tpu.memory_space<vmem>>, vector<1x8x8xbf16>
    %9 = vector.shape_cast %8 : vector<1x8x8xbf16> to vector<8x8xbf16>
    %cst_9 = arith.constant dense<0.000000e+00> : vector<8x324xf32>
    %10 = tpu.matmul %9, %7, %cst_9 {dimension_numbers = #tpu.dot_dimension_numbers<[1], [0], [0], [1], [0, 0, 1, 1], [], []>} : vector<8x8xbf16>, vector<8x324xbf16>, vector<8x324xf32> -> vector<8x324xf32>
    %11 = arith.addf %6, %10 : vector<8x324xf32>
    %12 = vector.extract_strided_slice %2 {offsets = [0, 2], sizes = [8, 324], strides = [1, 1]} : vector<8x362xbf16> to vector<8x324xbf16>
    %c2 = arith.constant 2 : index
    %c0_10 = arith.constant 0 : index
    %c0_11 = arith.constant 0 : index
    %13 = vector.load %arg2[%c2, %c0_10, %c0_11] : memref<9x8x8xbf16, #tpu.memory_space<vmem>>, vector<1x8x8xbf16>
    %14 = vector.shape_cast %13 : vector<1x8x8xbf16> to vector<8x8xbf16>
    %cst_12 = arith.constant dense<0.000000e+00> : vector<8x324xf32>
    %15 = tpu.matmul %14, %12, %cst_12 {dimension_numbers = #tpu.dot_dimension_numbers<[1], [0], [0], [1], [0, 0, 1, 1], [], []>} : vector<8x8xbf16>, vector<8x324xbf16>, vector<8x324xf32> -> vector<8x324xf32>
    %16 = arith.addf %11, %15 : vector<8x324xf32>
    %17 = vector.extract_strided_slice %2 {offsets = [0, 18], sizes = [8, 324], strides = [1, 1]} : vector<8x362xbf16> to vector<8x324xbf16>
    %c3 = arith.constant 3 : index
    %c0_13 = arith.constant 0 : index
    %c0_14 = arith.constant 0 : index
    %18 = vector.load %arg2[%c3, %c0_13, %c0_14] : memref<9x8x8xbf16, #tpu.memory_space<vmem>>, vector<1x8x8xbf16>
    %19 = vector.shape_cast %18 : vector<1x8x8xbf16> to vector<8x8xbf16>
    %cst_15 = arith.constant dense<0.000000e+00> : vector<8x324xf32>
    %20 = tpu.matmul %19, %17, %cst_15 {dimension_numbers = #tpu.dot_dimension_numbers<[1], [0], [0], [1], [0, 0, 1, 1], [], []>} : vector<8x8xbf16>, vector<8x324xbf16>, vector<8x324xf32> -> vector<8x324xf32>
    %21 = arith.addf %16, %20 : vector<8x324xf32>
    %22 = vector.extract_strided_slice %2 {offsets = [0, 19], sizes = [8, 324], strides = [1, 1]} : vector<8x362xbf16> to vector<8x324xbf16>
    %c4 = arith.constant 4 : index
    %c0_16 = arith.constant 0 : index
    %c0_17 = arith.constant 0 : index
    %23 = vector.load %arg2[%c4, %c0_16, %c0_17] : memref<9x8x8xbf16, #tpu.memory_space<vmem>>, vector<1x8x8xbf16>
    %24 = vector.shape_cast %23 : vector<1x8x8xbf16> to vector<8x8xbf16>
    %cst_18 = arith.constant dense<0.000000e+00> : vector<8x324xf32>
    %25 = tpu.matmul %24, %22, %cst_18 {dimension_numbers = #tpu.dot_dimension_numbers<[1], [0], [0], [1], [0, 0, 1, 1], [], []>} : vector<8x8xbf16>, vector<8x324xbf16>, vector<8x324xf32> -> vector<8x324xf32>
    %26 = arith.addf %21, %25 : vector<8x324xf32>
    %27 = vector.extract_strided_slice %2 {offsets = [0, 20], sizes = [8, 324], strides = [1, 1]} : vector<8x362xbf16> to vector<8x324xbf16>
    %c5 = arith.constant 5 : index
    %c0_19 = arith.constant 0 : index
    %c0_20 = arith.constant 0 : index
    %28 = vector.load %arg2[%c5, %c0_19, %c0_20] : memref<9x8x8xbf16, #tpu.memory_space<vmem>>, vector<1x8x8xbf16>
    %29 = vector.shape_cast %28 : vector<1x8x8xbf16> to vector<8x8xbf16>
    %cst_21 = arith.constant dense<0.000000e+00> : vector<8x324xf32>
    %30 = tpu.matmul %29, %27, %cst_21 {dimension_numbers = #tpu.dot_dimension_numbers<[1], [0], [0], [1], [0, 0, 1, 1], [], []>} : vector<8x8xbf16>, vector<8x324xbf16>, vector<8x324xf32> -> vector<8x324xf32>
    %31 = arith.addf %26, %30 : vector<8x324xf32>
    %32 = vector.extract_strided_slice %2 {offsets = [0, 36], sizes = [8, 324], strides = [1, 1]} : vector<8x362xbf16> to vector<8x324xbf16>
    %c6 = arith.constant 6 : index
    %c0_22 = arith.constant 0 : index
    %c0_23 = arith.constant 0 : index
    %33 = vector.load %arg2[%c6, %c0_22, %c0_23] : memref<9x8x8xbf16, #tpu.memory_space<vmem>>, vector<1x8x8xbf16>
    %34 = vector.shape_cast %33 : vector<1x8x8xbf16> to vector<8x8xbf16>
    %cst_24 = arith.constant dense<0.000000e+00> : vector<8x324xf32>
    %35 = tpu.matmul %34, %32, %cst_24 {dimension_numbers = #tpu.dot_dimension_numbers<[1], [0], [0], [1], [0, 0, 1, 1], [], []>} : vector<8x8xbf16>, vector<8x324xbf16>, vector<8x324xf32> -> vector<8x324xf32>
    %36 = arith.addf %31, %35 : vector<8x324xf32>
    %37 = vector.extract_strided_slice %2 {offsets = [0, 37], sizes = [8, 324], strides = [1, 1]} : vector<8x362xbf16> to vector<8x324xbf16>
    %c7 = arith.constant 7 : index
    %c0_25 = arith.constant 0 : index
    %c0_26 = arith.constant 0 : index
    %38 = vector.load %arg2[%c7, %c0_25, %c0_26] : memref<9x8x8xbf16, #tpu.memory_space<vmem>>, vector<1x8x8xbf16>
    %39 = vector.shape_cast %38 : vector<1x8x8xbf16> to vector<8x8xbf16>
    %cst_27 = arith.constant dense<0.000000e+00> : vector<8x324xf32>
    %40 = tpu.matmul %39, %37, %cst_27 {dimension_numbers = #tpu.dot_dimension_numbers<[1], [0], [0], [1], [0, 0, 1, 1], [], []>} : vector<8x8xbf16>, vector<8x324xbf16>, vector<8x324xf32> -> vector<8x324xf32>
    %41 = arith.addf %36, %40 : vector<8x324xf32>
    %42 = vector.extract_strided_slice %2 {offsets = [0, 38], sizes = [8, 324], strides = [1, 1]} : vector<8x362xbf16> to vector<8x324xbf16>
    %c8 = arith.constant 8 : index
    %c0_28 = arith.constant 0 : index
    %c0_29 = arith.constant 0 : index
    %43 = vector.load %arg2[%c8, %c0_28, %c0_29] : memref<9x8x8xbf16, #tpu.memory_space<vmem>>, vector<1x8x8xbf16>
    %44 = vector.shape_cast %43 : vector<1x8x8xbf16> to vector<8x8xbf16>
    %cst_30 = arith.constant dense<0.000000e+00> : vector<8x324xf32>
    %45 = tpu.matmul %44, %42, %cst_30 {dimension_numbers = #tpu.dot_dimension_numbers<[1], [0], [0], [1], [0, 0, 1, 1], [], []>} : vector<8x8xbf16>, vector<8x324xbf16>, vector<8x324xf32> -> vector<8x324xf32>
    %46 = arith.addf %41, %45 : vector<8x324xf32>
    %47 = vector.broadcast %0 : vector<1x324xf32> to vector<8x324xf32>
    %48 = arith.mulf %46, %47 : vector<8x324xf32>
    %49 = vector.shape_cast %48 : vector<8x324xf32> to vector<1x8x324xf32>
    %cst_31 = arith.constant dense<0.000000e+00> : vector<1xf32>
    %50 = vector.multi_reduction <add>, %49, %cst_31 [1, 2] : vector<1x8x324xf32> to vector<1xf32>
    %51 = vector.shape_cast %50 : vector<1xf32> to vector<1x1x1xf32>
    %52 = vector.extract %51[0, 0, 0] : f32 from vector<1x1x1xf32>
    %cst_32 = arith.constant 2.048000e+03 : f32
    %53 = arith.divf %52, %cst_32 : f32
    %54 = vector.broadcast %53 : f32 to vector<8x324xf32>
    %55 = arith.subf %46, %54 : vector<8x324xf32>
    %56 = vector.broadcast %0 : vector<1x324xf32> to vector<8x324xf32>
    %57 = arith.mulf %55, %56 : vector<8x324xf32>
    %58 = arith.mulf %57, %57 : vector<8x324xf32>
    %59 = vector.shape_cast %58 : vector<8x324xf32> to vector<1x8x324xf32>
    %cst_33 = arith.constant dense<0.000000e+00> : vector<1xf32>
    %60 = vector.multi_reduction <add>, %59, %cst_33 [1, 2] : vector<1x8x324xf32> to vector<1xf32>
    %61 = vector.shape_cast %60 : vector<1xf32> to vector<1x1x1xf32>
    %62 = vector.extract %61[0, 0, 0] : f32 from vector<1x1x1xf32>
    %cst_34 = arith.constant 2.048000e+03 : f32
    %63 = arith.divf %62, %cst_34 : f32
    %64 = vector.broadcast %53 : f32 to vector<8x324xf32>
    %65 = arith.subf %46, %64 : vector<8x324xf32>
    %cst_35 = arith.constant 9.99999974E-6 : f32
    %66 = arith.addf %63, %cst_35 : f32
    %67 = math.rsqrt %66 : f32
    %68 = vector.broadcast %67 : f32 to vector<8x324xf32>
    %69 = arith.mulf %65, %68 : vector<8x324xf32>
    %c0_36 = arith.constant 0 : index
    %c0_37 = arith.constant 0 : index
    %70 = vector.load %arg3[%c0_36, %c0_37] : memref<8x1xf32, #tpu.memory_space<vmem>>, vector<8x1xf32>
    %71 = vector.broadcast %70 : vector<8x1xf32> to vector<8x324xf32>
    %72 = arith.mulf %69, %71 : vector<8x324xf32>
    %c0_38 = arith.constant 0 : index
    %c0_39 = arith.constant 0 : index
    %73 = vector.load %arg4[%c0_38, %c0_39] : memref<8x1xf32, #tpu.memory_space<vmem>>, vector<8x1xf32>
    %74 = vector.broadcast %73 : vector<8x1xf32> to vector<8x324xf32>
    %75 = arith.addf %72, %74 : vector<8x324xf32>
    %cst_40 = arith.constant 5.000000e-01 : f32
    %76 = vector.broadcast %cst_40 : f32 to vector<8x324xf32>
    %77 = arith.mulf %76, %75 : vector<8x324xf32>
    %cst_41 = arith.constant 0.707106769 : f32
    %78 = vector.broadcast %cst_41 : f32 to vector<8x324xf32>
    %79 = arith.mulf %75, %78 : vector<8x324xf32>
    %80 = math.erf %79 : vector<8x324xf32>
    %cst_42 = arith.constant 1.000000e+00 : f32
    %81 = vector.broadcast %cst_42 : f32 to vector<8x324xf32>
    %82 = arith.addf %81, %80 : vector<8x324xf32>
    %83 = arith.mulf %77, %82 : vector<8x324xf32>
    %84 = vector.broadcast %0 : vector<1x324xf32> to vector<8x324xf32>
    %85 = arith.mulf %83, %84 : vector<8x324xf32>
    %86 = arith.truncf %85 : vector<8x324xf32> to vector<8x324xbf16>
    %cst_43 = arith.constant 0.000000e+00 : bf16
    %87 = vector.broadcast %cst_43 : bf16 to vector<8x19xbf16>
    %88 = tpu.concatenate %87, %86, %87 in 1 : vector<8x19xbf16>, vector<8x324xbf16>, vector<8x19xbf16> -> vector<8x362xbf16>
    %89 = vector.extract_strided_slice %88 {offsets = [0, 0], sizes = [8, 324], strides = [1, 1]} : vector<8x362xbf16> to vector<8x324xbf16>
    %c0_44 = arith.constant 0 : index
    %c0_45 = arith.constant 0 : index
    %c0_46 = arith.constant 0 : index
    %90 = vector.load %arg5[%c0_44, %c0_45, %c0_46] : memref<9x8x8xbf16, #tpu.memory_space<vmem>>, vector<1x8x8xbf16>
    %91 = vector.shape_cast %90 : vector<1x8x8xbf16> to vector<8x8xbf16>
    %cst_47 = arith.constant dense<0.000000e+00> : vector<8x324xf32>
    %92 = tpu.matmul %91, %89, %cst_47 {dimension_numbers = #tpu.dot_dimension_numbers<[1], [0], [0], [1], [0, 0, 1, 1], [], []>} : vector<8x8xbf16>, vector<8x324xbf16>, vector<8x324xf32> -> vector<8x324xf32>
    %93 = vector.extract_strided_slice %88 {offsets = [0, 1], sizes = [8, 324], strides = [1, 1]} : vector<8x362xbf16> to vector<8x324xbf16>
    %c1_48 = arith.constant 1 : index
    %c0_49 = arith.constant 0 : index
    %c0_50 = arith.constant 0 : index
    %94 = vector.load %arg5[%c1_48, %c0_49, %c0_50] : memref<9x8x8xbf16, #tpu.memory_space<vmem>>, vector<1x8x8xbf16>
    %95 = vector.shape_cast %94 : vector<1x8x8xbf16> to vector<8x8xbf16>
    %cst_51 = arith.constant dense<0.000000e+00> : vector<8x324xf32>
    %96 = tpu.matmul %95, %93, %cst_51 {dimension_numbers = #tpu.dot_dimension_numbers<[1], [0], [0], [1], [0, 0, 1, 1], [], []>} : vector<8x8xbf16>, vector<8x324xbf16>, vector<8x324xf32> -> vector<8x324xf32>
    %97 = arith.addf %92, %96 : vector<8x324xf32>
    %98 = vector.extract_strided_slice %88 {offsets = [0, 2], sizes = [8, 324], strides = [1, 1]} : vector<8x362xbf16> to vector<8x324xbf16>
    %c2_52 = arith.constant 2 : index
    %c0_53 = arith.constant 0 : index
    %c0_54 = arith.constant 0 : index
    %99 = vector.load %arg5[%c2_52, %c0_53, %c0_54] : memref<9x8x8xbf16, #tpu.memory_space<vmem>>, vector<1x8x8xbf16>
    %100 = vector.shape_cast %99 : vector<1x8x8xbf16> to vector<8x8xbf16>
    %cst_55 = arith.constant dense<0.000000e+00> : vector<8x324xf32>
    %101 = tpu.matmul %100, %98, %cst_55 {dimension_numbers = #tpu.dot_dimension_numbers<[1], [0], [0], [1], [0, 0, 1, 1], [], []>} : vector<8x8xbf16>, vector<8x324xbf16>, vector<8x324xf32> -> vector<8x324xf32>
    %102 = arith.addf %97, %101 : vector<8x324xf32>
    %103 = vector.extract_strided_slice %88 {offsets = [0, 18], sizes = [8, 324], strides = [1, 1]} : vector<8x362xbf16> to vector<8x324xbf16>
    %c3_56 = arith.constant 3 : index
    %c0_57 = arith.constant 0 : index
    %c0_58 = arith.constant 0 : index
    %104 = vector.load %arg5[%c3_56, %c0_57, %c0_58] : memref<9x8x8xbf16, #tpu.memory_space<vmem>>, vector<1x8x8xbf16>
    %105 = vector.shape_cast %104 : vector<1x8x8xbf16> to vector<8x8xbf16>
    %cst_59 = arith.constant dense<0.000000e+00> : vector<8x324xf32>
    %106 = tpu.matmul %105, %103, %cst_59 {dimension_numbers = #tpu.dot_dimension_numbers<[1], [0], [0], [1], [0, 0, 1, 1], [], []>} : vector<8x8xbf16>, vector<8x324xbf16>, vector<8x324xf32> -> vector<8x324xf32>
    %107 = arith.addf %102, %106 : vector<8x324xf32>
    %108 = vector.extract_strided_slice %88 {offsets = [0, 19], sizes = [8, 324], strides = [1, 1]} : vector<8x362xbf16> to vector<8x324xbf16>
    %c4_60 = arith.constant 4 : index
    %c0_61 = arith.constant 0 : index
    %c0_62 = arith.constant 0 : index
    %109 = vector.load %arg5[%c4_60, %c0_61, %c0_62] : memref<9x8x8xbf16, #tpu.memory_space<vmem>>, vector<1x8x8xbf16>
    %110 = vector.shape_cast %109 : vector<1x8x8xbf16> to vector<8x8xbf16>
    %cst_63 = arith.constant dense<0.000000e+00> : vector<8x324xf32>
    %111 = tpu.matmul %110, %108, %cst_63 {dimension_numbers = #tpu.dot_dimension_numbers<[1], [0], [0], [1], [0, 0, 1, 1], [], []>} : vector<8x8xbf16>, vector<8x324xbf16>, vector<8x324xf32> -> vector<8x324xf32>
    %112 = arith.addf %107, %111 : vector<8x324xf32>
    %113 = vector.extract_strided_slice %88 {offsets = [0, 20], sizes = [8, 324], strides = [1, 1]} : vector<8x362xbf16> to vector<8x324xbf16>
    %c5_64 = arith.constant 5 : index
    %c0_65 = arith.constant 0 : index
    %c0_66 = arith.constant 0 : index
    %114 = vector.load %arg5[%c5_64, %c0_65, %c0_66] : memref<9x8x8xbf16, #tpu.memory_space<vmem>>, vector<1x8x8xbf16>
    %115 = vector.shape_cast %114 : vector<1x8x8xbf16> to vector<8x8xbf16>
    %cst_67 = arith.constant dense<0.000000e+00> : vector<8x324xf32>
    %116 = tpu.matmul %115, %113, %cst_67 {dimension_numbers = #tpu.dot_dimension_numbers<[1], [0], [0], [1], [0, 0, 1, 1], [], []>} : vector<8x8xbf16>, vector<8x324xbf16>, vector<8x324xf32> -> vector<8x324xf32>
    %117 = arith.addf %112, %116 : vector<8x324xf32>
    %118 = vector.extract_strided_slice %88 {offsets = [0, 36], sizes = [8, 324], strides = [1, 1]} : vector<8x362xbf16> to vector<8x324xbf16>
    %c6_68 = arith.constant 6 : index
    %c0_69 = arith.constant 0 : index
    %c0_70 = arith.constant 0 : index
    %119 = vector.load %arg5[%c6_68, %c0_69, %c0_70] : memref<9x8x8xbf16, #tpu.memory_space<vmem>>, vector<1x8x8xbf16>
    %120 = vector.shape_cast %119 : vector<1x8x8xbf16> to vector<8x8xbf16>
    %cst_71 = arith.constant dense<0.000000e+00> : vector<8x324xf32>
    %121 = tpu.matmul %120, %118, %cst_71 {dimension_numbers = #tpu.dot_dimension_numbers<[1], [0], [0], [1], [0, 0, 1, 1], [], []>} : vector<8x8xbf16>, vector<8x324xbf16>, vector<8x324xf32> -> vector<8x324xf32>
    %122 = arith.addf %117, %121 : vector<8x324xf32>
    %123 = vector.extract_strided_slice %88 {offsets = [0, 37], sizes = [8, 324], strides = [1, 1]} : vector<8x362xbf16> to vector<8x324xbf16>
    %c7_72 = arith.constant 7 : index
    %c0_73 = arith.constant 0 : index
    %c0_74 = arith.constant 0 : index
    %124 = vector.load %arg5[%c7_72, %c0_73, %c0_74] : memref<9x8x8xbf16, #tpu.memory_space<vmem>>, vector<1x8x8xbf16>
    %125 = vector.shape_cast %124 : vector<1x8x8xbf16> to vector<8x8xbf16>
    %cst_75 = arith.constant dense<0.000000e+00> : vector<8x324xf32>
    %126 = tpu.matmul %125, %123, %cst_75 {dimension_numbers = #tpu.dot_dimension_numbers<[1], [0], [0], [1], [0, 0, 1, 1], [], []>} : vector<8x8xbf16>, vector<8x324xbf16>, vector<8x324xf32> -> vector<8x324xf32>
    %127 = arith.addf %122, %126 : vector<8x324xf32>
    %128 = vector.extract_strided_slice %88 {offsets = [0, 38], sizes = [8, 324], strides = [1, 1]} : vector<8x362xbf16> to vector<8x324xbf16>
    %c8_76 = arith.constant 8 : index
    %c0_77 = arith.constant 0 : index
    %c0_78 = arith.constant 0 : index
    %129 = vector.load %arg5[%c8_76, %c0_77, %c0_78] : memref<9x8x8xbf16, #tpu.memory_space<vmem>>, vector<1x8x8xbf16>
    %130 = vector.shape_cast %129 : vector<1x8x8xbf16> to vector<8x8xbf16>
    %cst_79 = arith.constant dense<0.000000e+00> : vector<8x324xf32>
    %131 = tpu.matmul %130, %128, %cst_79 {dimension_numbers = #tpu.dot_dimension_numbers<[1], [0], [0], [1], [0, 0, 1, 1], [], []>} : vector<8x8xbf16>, vector<8x324xbf16>, vector<8x324xf32> -> vector<8x324xf32>
    %132 = arith.addf %127, %131 : vector<8x324xf32>
    %133 = vector.broadcast %0 : vector<1x324xf32> to vector<8x324xf32>
    %134 = arith.mulf %132, %133 : vector<8x324xf32>
    %135 = vector.shape_cast %134 : vector<8x324xf32> to vector<1x8x324xf32>
    %cst_80 = arith.constant dense<0.000000e+00> : vector<1xf32>
    %136 = vector.multi_reduction <add>, %135, %cst_80 [1, 2] : vector<1x8x324xf32> to vector<1xf32>
    %137 = vector.shape_cast %136 : vector<1xf32> to vector<1x1x1xf32>
    %138 = vector.extract %137[0, 0, 0] : f32 from vector<1x1x1xf32>
    %cst_81 = arith.constant 2.048000e+03 : f32
    %139 = arith.divf %138, %cst_81 : f32
    %140 = vector.broadcast %139 : f32 to vector<8x324xf32>
    %141 = arith.subf %132, %140 : vector<8x324xf32>
    %142 = vector.broadcast %0 : vector<1x324xf32> to vector<8x324xf32>
    %143 = arith.mulf %141, %142 : vector<8x324xf32>
    %144 = arith.mulf %143, %143 : vector<8x324xf32>
    %145 = vector.shape_cast %144 : vector<8x324xf32> to vector<1x8x324xf32>
    %cst_82 = arith.constant dense<0.000000e+00> : vector<1xf32>
    %146 = vector.multi_reduction <add>, %145, %cst_82 [1, 2] : vector<1x8x324xf32> to vector<1xf32>
    %147 = vector.shape_cast %146 : vector<1xf32> to vector<1x1x1xf32>
    %148 = vector.extract %147[0, 0, 0] : f32 from vector<1x1x1xf32>
    %cst_83 = arith.constant 2.048000e+03 : f32
    %149 = arith.divf %148, %cst_83 : f32
    %150 = vector.broadcast %139 : f32 to vector<8x324xf32>
    %151 = arith.subf %132, %150 : vector<8x324xf32>
    %cst_84 = arith.constant 9.99999974E-6 : f32
    %152 = arith.addf %149, %cst_84 : f32
    %153 = math.rsqrt %152 : f32
    %154 = vector.broadcast %153 : f32 to vector<8x324xf32>
    %155 = arith.mulf %151, %154 : vector<8x324xf32>
    %c0_85 = arith.constant 0 : index
    %c0_86 = arith.constant 0 : index
    %156 = vector.load %arg6[%c0_85, %c0_86] : memref<8x1xf32, #tpu.memory_space<vmem>>, vector<8x1xf32>
    %157 = vector.broadcast %156 : vector<8x1xf32> to vector<8x324xf32>
    %158 = arith.mulf %155, %157 : vector<8x324xf32>
    %c0_87 = arith.constant 0 : index
    %c0_88 = arith.constant 0 : index
    %159 = vector.load %arg7[%c0_87, %c0_88] : memref<8x1xf32, #tpu.memory_space<vmem>>, vector<8x1xf32>
    %160 = vector.broadcast %159 : vector<8x1xf32> to vector<8x324xf32>
    %161 = arith.addf %158, %160 : vector<8x324xf32>
    %c0_89 = arith.constant 0 : index
    %c0_90 = arith.constant 0 : index
    %c0_91 = arith.constant 0 : index
    %162 = vector.load %arg9[%c0_89, %c0_90, %c0_91] : memref<1x8x324xf32, #tpu.memory_space<vmem>>, vector<1x8x324xf32>
    %163 = vector.shape_cast %162 : vector<1x8x324xf32> to vector<8x324xf32>
    %164 = vector.shape_cast %161 : vector<8x324xf32> to vector<1x8x324xf32>
    tpu.vector_store %arg9[%c0_89, %c0_90, %c0_91], %164 {strides = array<i32>} : memref<1x8x324xf32, #tpu.memory_space<vmem>>, vector<1x8x324xf32>,
    return
  }
  func.func @transform_0(%arg0: i32) -> (i32, i32, i32) {
    %c0_i32 = arith.constant 0 : i32
    %c0_i32_0 = arith.constant 0 : i32
    %c0_i32_1 = arith.constant 0 : i32
    return %arg0, %c0_i32, %c0_i32_0 : i32, i32, i32
  }
  func.func @transform_1(%arg0: i32) -> (i32, i32, i32) {
    %c0_i32 = arith.constant 0 : i32
    %c0_i32_0 = arith.constant 0 : i32
    %c0_i32_1 = arith.constant 0 : i32
    %c0_i32_2 = arith.constant 0 : i32
    return %c0_i32, %c0_i32_0, %c0_i32_1 : i32, i32, i32
  }
  func.func @transform_2(%arg0: i32) -> (i32, i32) {
    %c0_i32 = arith.constant 0 : i32
    %c0_i32_0 = arith.constant 0 : i32
    %c0_i32_1 = arith.constant 0 : i32
    return %c0_i32, %c0_i32_0 : i32, i32
  }
  func.func @transform_3(%arg0: i32) -> (i32, i32) {
    %c0_i32 = arith.constant 0 : i32
    %c0_i32_0 = arith.constant 0 : i32
    %c0_i32_1 = arith.constant 0 : i32
    return %c0_i32, %c0_i32_0 : i32, i32
  }
  func.func @transform_4(%arg0: i32) -> (i32, i32, i32) {
    %c0_i32 = arith.constant 0 : i32
    %c0_i32_0 = arith.constant 0 : i32
    %c0_i32_1 = arith.constant 0 : i32
    %c0_i32_2 = arith.constant 0 : i32
    return %c0_i32, %c0_i32_0, %c0_i32_1 : i32, i32, i32
  }
  func.func @transform_5(%arg0: i32) -> (i32, i32) {
    %c0_i32 = arith.constant 0 : i32
    %c0_i32_0 = arith.constant 0 : i32
    %c0_i32_1 = arith.constant 0 : i32
    return %c0_i32, %c0_i32_0 : i32, i32
  }
  func.func @transform_6(%arg0: i32) -> (i32, i32) {
    %c0_i32 = arith.constant 0 : i32
    %c0_i32_0 = arith.constant 0 : i32
    %c0_i32_1 = arith.constant 0 : i32
    return %c0_i32, %c0_i32_0 : i32, i32
  }
  func.func @transform_7(%arg0: i32) -> (i32, i32) {
    %c0_i32 = arith.constant 0 : i32
    %c0_i32_0 = arith.constant 0 : i32
    %c0_i32_1 = arith.constant 0 : i32
    return %c0_i32, %c0_i32_0 : i32, i32
  }
  func.func @transform_8(%arg0: i32) -> (i32, i32, i32) {
    %c0_i32 = arith.constant 0 : i32
    %c0_i32_0 = arith.constant 0 : i32
    %c0_i32_1 = arith.constant 0 : i32
    return %arg0, %c0_i32, %c0_i32_0 : i32, i32, i32
  }
}

</mosaic_0001>

<bundles_post_ra>
// kernel: tpu_custom_call.1
= control target key start
LH: loop header
LB: loop body
LE: loop exit
PB: predicated region body
PF: predicated region fallthrough
CT: control target
= control target key end

     0   :  { %13 = vsyncpa [#allocation3], 0  ;;  %s3471_s0 = inlined_call_operand.vmem [shape: bf16[2,8,362], index: 0, kind: input, shape index: {}]   ;;  %s3472_s1 = inlined_call_operand.vmem [shape: bf16[9,8,8], index: 1, kind: input, shape index: {}]   ;;  %s3473_s2 = inlined_call_operand.vmem [shape: f32[8,1], index: 2, kind: input, shape index: {}]   ;;  %s3474_s3 = inlined_call_operand.vmem [shape: f32[8,1], index: 3, kind: input, shape index: {}]   ;;  %s3475_s4 = inlined_call_operand.vmem [shape: bf16[9,8,8], index: 4, kind: input, shape index: {}]   ;;  %s3476_s5 = inlined_call_operand.vmem [shape: f32[8,1], index: 5, kind: input, shape index: {}]   ;;  %s3477_s6 = inlined_call_operand.vmem [shape: f32[8,1], index: 6, kind: input, shape index: {}]   ;;  %s3478_s7 = inlined_call_operand.vmem [shape: f32[1,324], index: 7, kind: input, shape index: {}]   ;;  %s3479_s8 = inlined_call_operand.hbm [shape: f32[2,8,324], index: 8, kind: output, shape index: {}]  }
   0x1   :  { %15 = vsyncpa [#allocation3 + $0x1], 0  ;;  %s3032_s27 = smov 0   ;;  %s3034_s28 = smov 0  }
   0x2   :  { %s3036_s29 = smov 0   ;;  %s3038_s30 = smov 0  }
   0x3 LB: > { %s3053_s9 = sadd.s32 4294967295, %s2972_s30   ;;  %s2476_s10 = sadd.s32 4294967294, %s2972_s30   ;;  %s2972_s30 = sphi %s3038_s30, %s3491_s30   ;;  %s2968_s29 = sphi %s3036_s29, %s3490_s29   ;;  %s2964_s28 = sphi %s3034_s28, %s3489_s28   ;;  %s2960_s27 = sphi %s3032_s27, %s3488_s27  }
   0x4   : > { %s3057_s11 = sadd.s32 1, %s2972_s30   ;;  %s201_s12 = sadd.s32 1, %s2968_s29 }
   0x5   : > { %s198_s13 = ssub.s32 %s2972_s30, %s3057_s11  ;;  %p211_p0 = scmp.ne.s32.totalorder %s2968_s29, %s2964_s28 }
   0x6   : > { %p199_p1 = scmp.eq.s32.totalorder %s198_s13, 0  ;;  %p212_p2 = scmp.eq.s32.totalorder %s3053_s9, 1 }
   0x7   : > { %p217_p3 = scmp.ne.s32.totalorder %s2964_s28, %s2960_s27  ;;  %p218_p4 = scmp.eq.s32.totalorder %s2476_s10, 1 }
   0x8   : > { %s3068_s14 = scalar_select %p199_p1, %s2968_s29, %s201_s12  }
   0x9   : > { %p3070_p5 = por %p212_p2, %p211_p0  ;;  %p3074_p6 = por %p218_p4, %p217_p3 }
   0xa   : > { %p2479_p7 = scmp.ge.s32.totalorder %s2972_s30, 1  ;;  %p265_p8 = scmp.lt.s32.totalorder %s2972_s30, 3 }
   0xc   : > { %p266_p9 = pnand %p2479_p7, %p265_p8 }
   0xd   : > { %p299_p10 = scmp.lt.s32.totalorder (!%p266_p9), %s3053_s9, 1  ;;  %v2974_v0 = vmov (!%p266_p9), 0.0   ;;  %vm2975_vm0 = vmmov (!%p266_p9), 0   ;;  %v2976_v1 = vmov (!%p266_p9), 0   ;;  %s2977_s22 = smov (!%p266_p9), 127   ;;  %vm332_vm1 = vcmask (!%p266_p9), 1043456  }
   0xe   : > { %269 = sbr.rel (%p266_p9) target bundleno = 2060 (0x80c), region = 52  ;;  %2593 = vmatprep.subr.bf16.mxu1 (!%p266_p9), %v2974_v0  ;;  %2595 = vmatprep.mubr.msk.bf16.mxu1 (!%p266_p9), %vm2975_vm0, %v2974_v0  ;;  %s2978_s23 = smov (!%p266_p9), 126   ;;  %v2481_v9 = vld [vmem:[%s3472_s1 + $0x4] sm:$0xf] (!%p266_p9)  ;;  %vm328_vm2 = vcmask (!%p266_p9), 64512   ;;  %vm325_vm3 = vcmask (!%p266_p9), 1039360  }
   0xf   : > { %374 = vmatprep.mubr.bf16.mxu0 (!%p266_p9), %v2976_v1  ;;  %2895 = vset.pattern.permute.xlu0 (!%p266_p9), %v2976_v1  ;;  %s2979_s24 = smov (!%p266_p9), 110   ;;  %s2980_s25 = smov (!%p266_p9), 109   ;;  %vm524_vm4 = vcmask (!%p266_p9), 1031168   ;;  %v308_v21 = vld [vmem:[%s3472_s1] sm:$0xf] (!%p266_p9)  ;;  %vm631_vm5 = vcmask (!%p266_p9), 900096  }
  0x10   : > { %2896 = vset.pattern.permute.xlu1 (!%p266_p9), %v2976_v1  ;;  %s2981_s26 = smov (!%p266_p9), 108   ;;  %s2982_s10 = smov (!%p266_p9), 92   ;;  %v2491_v29 = vld [vmem:[%s3472_s1 + $0x8] sm:$0xf] (!%p266_p9)  ;;  %vm738_vm6 = vcmask (!%p266_p9), 891904   ;;  %vm845_vm7 = vcmask (!%p266_p9), 883712  }
  0x11   : > { %s3482_s12 = smov (!%p266_p9), 91   ;;  %s3480_s13 = smov (!%p266_p9), 90   ;;  %v2495_v37 = vld [vmem:[%s3472_s1 + $0xc] sm:$0xf] (!%p266_p9)  ;;  %v2499_v45 = vld [vmem:[%s3472_s1 + $0x10] sm:$0xf] (!%p266_p9) }
  0x12   : > { %vm952_vm8 = vcmask (!%p266_p9), 752640   ;;  %v2503_v53 = vld [vmem:[%s3472_s1 + $0x14] sm:$0xf] (!%p266_p9)  ;;  %vm1059_vm9 = vcmask (!%p266_p9), 744448   ;;  %v2507_v61 = vld [vmem:[%s3472_s1 + $0x18] sm:$0xf] (!%p266_p9) }
  0x13   : > { %vm1166_vm10 = vcmask (!%p266_p9), 736256   ;;  %vm1285_vm11 = vcmask (!%p266_p9), 556032   ;;  %vm1381_vm12 = vcmask (!%p266_p9), 154624   ;;  %vm1388_vm13 = vcmask (!%p266_p9), 711680  }
  0x15   : > { %s300_s17 = scalar_select %p299_p10, %s3053_s9, 1 }
  0x17   : > { %s2830_s18 = smul.u32 12, %s300_s17 }
  0x19   : > { %s303_s21 = scalar_lea.vmem %s3471_s0, %s2830_s18 }
  0x1a   : > { %v2897_v2 = vld [vmem:[%s303_s21 + $0x8] ss:$0 sps:$4 sm:$0xff]   ;;  %v306_v3 = vld [vmem:[%s303_s21] sm:$0xff] }
  0x1b   : > { %v2482_v4 = vcombine.low %v306_v3, %v306_v3  ;;  %323 = vrot.lane.b32.xlu1 %v2897_v2, %s2977_s22  ;;  %v2483_v5 = vcombine.high %v306_v3, %v306_v3  ;;  %v433_v10 = vsel %vm332_vm1, %v2897_v2, 0 }
  0x1d   : > { %319 = vrot.lane.b32.xlu0 %v2482_v4, %s2977_s22  ;;  %v427_v17 = vsel %vm332_vm1, %v2482_v4, 0 }
  0x1f   : > { %518 = vrot.lane.b32.xlu1 %v2482_v4, %s2978_s23 }
  0x21   : > { %321 = vrot.lane.b32.xlu0 %v2483_v5, %s2977_s22 }
  0x23   : > { %522 = vrot.lane.b32.xlu1 %v2897_v2, %s2978_s23 }
  0x25   : > { %520 = vrot.lane.b32.xlu0 %v2483_v5, %s2978_s23 }
  0x27   : > { %627 = vrot.lane.b32.xlu1 %v2483_v5, %s2979_s24 }
  0x29   : > { %625 = vrot.lane.b32.xlu0 %v2482_v4, %s2979_s24 }
  0x2b   : > { %732 = vrot.lane.b32.xlu1 %v2482_v4, %s2980_s25 }
  0x2d   : > { %629 = vrot.lane.b32.xlu0 %v2897_v2, %s2979_s24 }
  0x2f   : > { %736 = vrot.lane.b32.xlu1 %v2897_v2, %s2980_s25 }
  0x31   : > { %734 = vrot.lane.b32.xlu0 %v2483_v5, %s2980_s25 }
  0x33   : > { %841 = vrot.lane.b32.xlu1 %v2483_v5, %s2981_s26 }
  0x35   : > { %839 = vrot.lane.b32.xlu0 %v2482_v4, %s2981_s26 }
  0x37   : > { %946 = vrot.lane.b32.xlu1 %v2482_v4, %s2982_s10 }
  0x39   : > { %843 = vrot.lane.b32.xlu0 %v2897_v2, %s2981_s26 }
  0x3b   : > { %950 = vrot.lane.b32.xlu1 %v2897_v2, %s2982_s10 }
  0x3d   : > { %948 = vrot.lane.b32.xlu0 %v2483_v5, %s2982_s10 }
  0x3f   : > { %1055 = vrot.lane.b32.xlu1 %v2483_v5, %s3482_s12 }
  0x41   : > { %1053 = vrot.lane.b32.xlu0 %v2482_v4, %s3482_s12 }
  0x43   : > { %1160 = vrot.lane.b32.xlu1 %v2482_v4, %s3480_s13 }
  0x45   : > { %1057 = vrot.lane.b32.xlu0 %v2897_v2, %s3482_s12 }
  0x47   : > { %1164 = vrot.lane.b32.xlu1 %v2897_v2, %s3480_s13 }
  0x49   : > { %1162 = vrot.lane.b32.xlu0 %v2483_v5, %s3480_s13 }
  0x8d   : > { %v324_v6 = vpop.permute.xlu1 %323 }
  0x8e   : > { %v340_v8 = vsel %vm332_vm1, %v324_v6, 0 }
  0x8f   : > { %v320_v7 = vpop.permute.xlu0 %319  ;;  %2594 = vmatpush3.bf16.msra.mxu1 %v340_v8 }
  0x90   : > { %2599 = vmatprep.subr.bf16.mxu1 %v2974_v0 }
  0x91   : > { %v519_v11 = vpop.permute.xlu1 %518 }
  0x92   : > { %2596 = vmatmul.mubr.msk.bf16.vlgmr.msra.gmra.mrb[0].mxu1 %vm328_vm2, %v2481_v9 }
  0x93   : > { %v322_v12 = vpop.permute.xlu0 %321  ;;  %2600 = vmatpush3.bf16.msra.mxu1 %v433_v10  ;;  %2601 = vmatprep.mubr.msk.bf16.mxu1 %vm2975_vm0, %v2974_v0  ;;  %v2515_v10 = vld [vmem:[%s3472_s1 + $0x20] sm:$0xf] }
  0x94   : > { %v327_v13 = vsel %vm325_vm3, %v322_v12, %v324_v6  ;;  %v326_v14 = vsel %vm325_vm3, %v320_v7, %v322_v12  ;;  %2605 = vmatprep.subr.bf16.mxu1 %v2974_v0  ;;  %v2511_v6 = vld [vmem:[%s3472_s1 + $0x1c] sm:$0xf] }
  0x95   : > { %2485 = vmatprep.subr.msk.bf16.mxu0 %vm332_vm1, %v327_v13  ;;  %v334_v15 = vsel %vm332_vm1, %v326_v14, 0  ;;  %v523_v16 = vpop.permute.xlu1 %522 }
  0x96   : > { %343 = vmatpush1.bf16.msra.mxu0 %v334_v15  ;;  %v537_v22 = vsel %vm332_vm1, %v523_v16, 0  ;;  %v305_v15 = vld [vmem:[%s3478_s7] sm:$0x7] }
  0x97   : > { %2488 = vmatprep.subr.msk.bf16.mxu0 %vm332_vm1, %v2483_v5  ;;  %v521_v18 = vpop.permute.xlu0 %520 }
  0x98   : > { %v526_v19 = vsel %vm524_vm4, %v521_v18, %v523_v16  ;;  %v525_v23 = vsel %vm524_vm4, %v519_v11, %v521_v18  ;;  %v1266_v11 = vlaneseq }
  0x99   : > { %2486 = vmatmul.mubr.msk.bf16.vlgmr.msra.gmra.mrb[0].mxu0 %vm328_vm2, %v2481_v9  ;;  %v628_v24 = vpop.permute.xlu1 %627  ;;  %v531_v26 = vsel %vm332_vm1, %v525_v23, 0 }
  0x9a   : > { %436 = vmatpush1.bf16.msra.mxu0 %v427_v17  ;;  %467 = vmatprep.mubr.bf16.mxu0 %v2976_v1  ;;  %v1267_v12 = vshrl.u32 %v1266_v11, 7 }
  0x9b   : > { %2492 = vmatprep.subr.msk.bf16.mxu0 %vm332_vm1, %v526_v19  ;;  %v626_v20 = vpop.permute.xlu0 %625 }
  0x9c   : > { %v632_v31 = vsel %vm631_vm5, %v626_v20, %v628_v24  ;;  %v1276_v13 = vsub.s32 2, %v1267_v12  ;;  %v1268_v14 = vsub.s32 0, %v1267_v12  ;;  %v1272_v17 = vsub.s32 1, %v1267_v12 }
  0x9d   : > { %v733_v28 = vpop.permute.xlu1 %732  ;;  %v638_v34 = vsel %vm332_vm1, %v632_v31, 0 }
  0x9e   : > { %2602 = vmatmul.mubr.msk.bf16.vlgmr.msra.gmra.mrb[0].mxu1 %vm328_vm2, %v308_v21  ;;  %v3242_v20 = vrot.slane %v305_v15, %v1276_v13  ;;  %v3246_v23 = vrot.slane %v305_v15, %v1272_v17 }
  0x9f   : > { %2606 = vmatpush3.bf16.msra.mxu1 %v537_v22  ;;  %2607 = vmatprep.mubr.msk.bf16.mxu1 %vm2975_vm0, %v2974_v0  ;;  %v630_v25 = vpop.permute.xlu0 %629  ;;  %v3244_v22 = vrot.slane %v305_v15, %v1268_v14 }
  0xa0   : > { %2611 = vmatprep.subr.bf16.mxu1 %v2974_v0  ;;  %v633_v27 = vsel %vm631_vm5, %v628_v24, %v630_v25  ;;  %v644_v30 = vsel %vm332_vm1, %v630_v25, 0 }
  0xa1   : > { %v737_v32 = vpop.permute.xlu1 %736 }
  0xa2   : > { %v751_v38 = vsel %vm332_vm1, %v737_v32, 0 }
  0xa3   : > { %v735_v33 = vpop.permute.xlu0 %734 }
  0xa4   : > { %v740_v35 = vsel %vm738_vm6, %v735_v33, %v737_v32  ;;  %v739_v39 = vsel %vm738_vm6, %v733_v28, %v735_v33 }
  0xa5   : > { %2489 = vmatmul.mubr.msk.bf16.vlgmr.msra.gmra.mrb[0].mxu0 %vm328_vm2, %v308_v21  ;;  %v842_v40 = vpop.permute.xlu1 %841  ;;  %v745_v42 = vsel %vm332_vm1, %v739_v39, 0 }
  0xa6   : > { %540 = vmatpush1.bf16.msra.mxu0 %v531_v26  ;;  %571 = vmatprep.mubr.bf16.mxu0 %v2976_v1 }
  0xa7   : > { %2496 = vmatprep.subr.msk.bf16.mxu0 %vm332_vm1, %v633_v27  ;;  %v840_v36 = vpop.permute.xlu0 %839 }
  0xa8   : > { %v846_v47 = vsel %vm845_vm7, %v840_v36, %v842_v40 }
  0xa9   : > { %v947_v44 = vpop.permute.xlu1 %946  ;;  %v852_v50 = vsel %vm332_vm1, %v846_v47, 0 }
  0xaa   : > { %2608 = vmatmul.mubr.msk.bf16.vlgmr.msra.gmra.mrb[0].mxu1 %vm328_vm2, %v2491_v29 }
  0xab   : > { %2612 = vmatpush3.bf16.msra.mxu1 %v644_v30  ;;  %2613 = vmatprep.mubr.msk.bf16.mxu1 %vm2975_vm0, %v2974_v0  ;;  %v844_v41 = vpop.permute.xlu0 %843 }
  0xac   : > { %2617 = vmatprep.subr.bf16.mxu1 %v2974_v0  ;;  %v847_v43 = vsel %vm845_vm7, %v842_v40, %v844_v41  ;;  %v858_v46 = vsel %vm332_vm1, %v844_v41, 0 }
  0xad   : > { %v951_v48 = vpop.permute.xlu1 %950 }
  0xae   : > { %v965_v54 = vsel %vm332_vm1, %v951_v48, 0 }
  0xaf   : > { %v949_v49 = vpop.permute.xlu0 %948 }
  0xb0   : > { %v954_v51 = vsel %vm952_vm8, %v949_v49, %v951_v48  ;;  %v953_v55 = vsel %vm952_vm8, %v947_v44, %v949_v49 }
  0xb1   : > { %2493 = vmatmul.mubr.msk.bf16.vlgmr.msra.gmra.mrb[0].mxu0 %vm328_vm2, %v2491_v29  ;;  %v1056_v56 = vpop.permute.xlu1 %1055  ;;  %v959_v58 = vsel %vm332_vm1, %v953_v55, 0  ;;  %v1342_v55 = vld [vmem:[%s3474_s3] sm:$0xff] }
  0xb2   : > { %647 = vmatpush1.bf16.msra.mxu0 %v638_v34  ;;  %678 = vmatprep.mubr.bf16.mxu0 %v2976_v1 }
  0xb3   : > { %2500 = vmatprep.subr.msk.bf16.mxu0 %vm332_vm1, %v740_v35  ;;  %v1054_v52 = vpop.permute.xlu0 %1053 }
  0xb4   : > { %v1060_v63 = vsel %vm1059_vm9, %v1054_v52, %v1056_v56 }
  0xb5   : > { %v1161_v60 = vpop.permute.xlu1 %1160  ;;  %v1066_v4 = vsel %vm332_vm1, %v1060_v63, 0 }
  0xb6   : > { %2614 = vmatmul.mubr.msk.bf16.vlgmr.msra.gmra.mrb[0].mxu1 %vm328_vm2, %v2495_v37 }
  0xb7   : > { %2618 = vmatpush3.bf16.msra.mxu1 %v751_v38  ;;  %2619 = vmatprep.mubr.msk.bf16.mxu1 %vm2975_vm0, %v2974_v0  ;;  %v1058_v57 = vpop.permute.xlu0 %1057 }
  0xb8   : > { %2623 = vmatprep.subr.bf16.mxu1 %v2974_v0  ;;  %v1061_v59 = vsel %vm1059_vm9, %v1056_v56, %v1058_v57  ;;  %v1072_v62 = vsel %vm332_vm1, %v1058_v57, 0 }
  0xb9   : > { %v1165_v2 = vpop.permute.xlu1 %1164 }
  0xba   : > { %v1179_v7 = vsel %vm332_vm1, %v1165_v2, 0 }
  0xbb   : > { %v1163_v3 = vpop.permute.xlu0 %1162 }
  0xbc   : > { %v1168_v5 = vsel %vm1166_vm10, %v1163_v3, %v1165_v2  ;;  %v1167_v8 = vsel %vm1166_vm10, %v1161_v60, %v1163_v3 }
  0xbd   : > { %2497 = vmatmul.mubr.msk.bf16.vlgmr.msra.gmra.mrb[0].mxu0 %vm328_vm2, %v2495_v37  ;;  %v1173_v9 = vsel %vm332_vm1, %v1167_v8, 0 }
  0xbe   : > { %754 = vmatpush1.bf16.msra.mxu0 %v745_v42  ;;  %785 = vmatprep.mubr.bf16.mxu0 %v2976_v1 }
  0xbf   : > { %2504 = vmatprep.subr.msk.bf16.mxu0 %vm332_vm1, %v847_v43 }
  0xc2   : > { %2620 = vmatmul.mubr.msk.bf16.vlgmr.msra.gmra.mrb[0].mxu1 %vm328_vm2, %v2499_v45 }
  0xc3   : > { %2624 = vmatpush3.bf16.msra.mxu1 %v858_v46  ;;  %2625 = vmatprep.mubr.msk.bf16.mxu1 %vm2975_vm0, %v2974_v0 }
  0xc4   : > { %2629 = vmatprep.subr.bf16.mxu1 %v2974_v0 }
  0xc9   : > { %2501 = vmatmul.mubr.msk.bf16.vlgmr.msra.gmra.mrb[0].mxu0 %vm328_vm2, %v2499_v45 }
  0xca   : > { %861 = vmatpush1.bf16.msra.mxu0 %v852_v50  ;;  %892 = vmatprep.mubr.bf16.mxu0 %v2976_v1 }
  0xcb   : > { %2508 = vmatprep.subr.msk.bf16.mxu0 %vm332_vm1, %v954_v51 }
  0xce   : > { %2626 = vmatmul.mubr.msk.bf16.vlgmr.msra.gmra.mrb[0].mxu1 %vm328_vm2, %v2503_v53 }
  0xcf   : > { %2630 = vmatpush3.bf16.msra.mxu1 %v965_v54  ;;  %2631 = vmatprep.mubr.msk.bf16.mxu1 %vm2975_vm0, %v2974_v0  ;;  %v1333_v54 = vld [vmem:[%s3473_s2] sm:$0xff] }
  0xd0   : > { %2635 = vmatprep.subr.bf16.mxu1 %v2974_v0 }
  0xd5   : > { %2505 = vmatmul.mubr.msk.bf16.vlgmr.msra.gmra.mrb[0].mxu0 %vm328_vm2, %v2503_v53 }
  0xd6   : > { %968 = vmatpush1.bf16.msra.mxu0 %v959_v58  ;;  %999 = vmatprep.mubr.bf16.mxu0 %v2976_v1 }
  0xd7   : > { %2512 = vmatprep.subr.msk.bf16.mxu0 %vm332_vm1, %v1061_v59 }
  0xda   : > { %2632 = vmatmul.mubr.msk.bf16.vlgmr.msra.gmra.mrb[0].mxu1 %vm328_vm2, %v2507_v61 }
  0xdb   : > { %2636 = vmatpush3.bf16.msra.mxu1 %v1072_v62  ;;  %2637 = vmatprep.mubr.msk.bf16.mxu1 %vm2975_vm0, %v2974_v0 }
  0xdc   : > { %2641 = vmatprep.subr.bf16.mxu1 %v2974_v0 }
  0xe1   : > { %2509 = vmatmul.mubr.msk.bf16.vlgmr.msra.gmra.mrb[0].mxu0 %vm328_vm2, %v2507_v61 }
  0xe2   : > { %1075 = vmatpush1.bf16.msra.mxu0 %v1066_v4  ;;  %1106 = vmatprep.mubr.bf16.mxu0 %v2976_v1 }
  0xe3   : > { %2516 = vmatprep.subr.msk.bf16.mxu0 %vm332_vm1, %v1168_v5 }
  0xe6   : > { %2638 = vmatmul.mubr.msk.bf16.vlgmr.msra.gmra.mrb[0].mxu1 %vm328_vm2, %v2511_v6 }
  0xe7   : > { %2642 = vmatpush3.bf16.msra.mxu1 %v1179_v7  ;;  %2643 = vmatprep.mubr.msk.bf16.mxu1 %vm2975_vm0, %v2974_v0 }
  0xe8   : > { %2647 = vmatprep.subr.bf16.mxu1 %v2974_v0 }
  0xed   : > { %2513 = vmatmul.mubr.msk.bf16.vlgmr.msra.gmra.mrb[0].mxu0 %vm328_vm2, %v2511_v6 }
  0xee   : > { %1182 = vmatpush1.bf16.msra.mxu0 %v1173_v9  ;;  %1213 = vmatprep.mubr.bf16.mxu0 %v2976_v1 }
  0xf2   : > { %2644 = vmatmul.mubr.msk.bf16.vlgmr.msra.gmra.mrb[0].mxu1 %vm328_vm2, %v2515_v10 }
  0xf3   : > { %2649 = vmatprep.mubr.msk.bf16.mxu1 %vm2975_vm0, %v2974_v0 }
  0xf9   : > { %2517 = vmatmul.mubr.msk.bf16.vlgmr.msra.gmra.mrb[0].mxu0 %vm328_vm2, %v2515_v10 }
  0xfa   : > { %1448 = vmatprep.mubr.bf16.mxu0 %v2976_v1 }
 0x1c5   : > { %v1256_v16 = vpop.f32.mrb[0].mxu1 }
 0x1c6   : > { %v2645_v18 = vpop.f32.mrb[1].mxu1  ;;  %v1283_v25 = vmul.f32 %v3242_v20, %v1256_v16 }
 0x1c7   : > { %v1259_v19 = vpop.f32.mrb[2].mxu1 }
 0x1c8   : > { %v2646_v21 = vpop.f32.mrb[3].mxu1  ;;  %v1286_v32 = vsel %vm1285_vm11, %v1283_v25, 0.0 }
 0x1cc   : > { %v1215_v24 = vpop.f32.mrb[0].mxu0 }
 0x1cd   : > { %v1281_v26 = vmul.f32 %v3244_v22, %v1215_v24  ;;  %v1217_v27 = vpop.f32.mrb[1].mxu0 }
 0x1ce   : > { %v1282_v28 = vmul.f32 %v3246_v23, %v1217_v27  ;;  %v1219_v29 = vpop.f32.mrb[2].mxu0 }
 0x1cf   : > { %v1220_v30 = vpop.f32.mrb[3].mxu0 }
 0x1d0   : > { %v1284_v31 = vadd.f32 %v1282_v28, %v1281_v26 }
 0x1d2   : > { %v1287_v33 = vadd.f32 %v1286_v32, %v1284_v31 }
 0x1d4   : > { %1288 = vadd.xlane.f32.xlu0 %v1287_v33 }
 0x1ea   : > { %1336 = vperm.xlu0 %2895, %v1333_v54   ;;  %v2519_v54 = vld [vmem:[%s3475_s4 + $0x4] sm:$0xf] }
 0x261   : > { %v1289_v34 = vpop.xlane.xlu0 %1288 }
 0x262   : > { %v1290_v35 = vrot.slane %v1289_v34, 4 }
 0x264   : > { %v1291_v36 = vadd.f32 %v1290_v35, %v1289_v34 }
 0x266   : > { %v1292_v37 = vrot.slane %v1291_v36, 2 }
 0x268   : > { %v1293_v38 = vadd.f32 %v1292_v37, %v1291_v36 }
 0x269   : > { %v1337_v4 = vpop.permute.xlu0 %1336 }
 0x26a   : > { %v1294_v39 = vrot.slane %v1293_v38, 1 }
 0x26c   : > { %v1295_v40 = vadd.f32 %v1294_v39, %v1293_v38 }
 0x26e   : > { %2831 = vpush %v1295_v40 }
 0x29f   : > { %s2832_s17 = spop %2831 }
 0x2a0   : > { %s1299_s18 = smul.f32 0.00048828125, %s2832_s17 }
 0x2a2   : > { %v1300_v41 = vstv %s1299_s18 }
 0x2a3   : > { %v1301_v42 = vsub.f32 %v1215_v24, %v1300_v41  ;;  %v1302_v43 = vsub.f32 %v1217_v27, %v1300_v41  ;;  %v1303_v44 = vsub.f32 %v1256_v16, %v1300_v41 }
 0x2a5   : > { %v1304_v45 = vmul.f32 %v1301_v42, %v3244_v22  ;;  %v1305_v46 = vmul.f32 %v1302_v43, %v3246_v23  ;;  %v1306_v47 = vmul.f32 %v1303_v44, %v3242_v20 }
 0x2a7   : > { %v1307_v48 = vmul.f32 %v1304_v45, %v1304_v45  ;;  %v1308_v49 = vmul.f32 %v1305_v46, %v1305_v46  ;;  %v1309_v50 = vmul.f32 %v1306_v47, %v1306_v47 }
 0x2a9   : > { %v1310_v51 = vadd.f32 %v1308_v49, %v1307_v48  ;;  %v1311_v52 = vsel %vm1285_vm11, %v1309_v50, 0.0 }
 0x2ab   : > { %v1312_v53 = vadd.f32 %v1311_v52, %v1310_v51 }
 0x2ad   : > { %1313 = vadd.xlane.f32.xlu1 %v1312_v53 }
 0x2be   : > { %1345 = vperm.xlu1 %2896, %v1342_v55  }
 0x33a   : > { %v1314_v56 = vpop.xlane.xlu1 %1313 }
 0x33b   : > { %v1315_v57 = vrot.slane %v1314_v56, 4 }
 0x33d   : > { %v1316_v58 = vadd.f32 %v1315_v57, %v1314_v56 }
 0x33e   : > { %v1346_v8 = vpop.permute.xlu1 %1345 }
 0x33f   : > { %v1317_v59 = vrot.slane %v1316_v58, 2 }
 0x341   : > { %v1318_v60 = vadd.f32 %v1317_v59, %v1316_v58 }
 0x343   : > { %v1319_v61 = vrot.slane %v1318_v60, 1 }
 0x345   : > { %v1320_v62 = vadd.f32 %v1319_v61, %v1318_v60  ;;  %v1391_v61 = vld [vmem:[%s3475_s4] sm:$0xf] }
 0x347   : > { %2833 = vpush %v1320_v62 }
 0x378   : > { %s2834_s18 = spop %2833 }
 0x379   : > { %s1324_s13 = smul.f32 0.00048828125, %s2834_s18 }
 0x37b   : > { %s1325_s12 = sadd.f32 1e-05, %s1324_s13  ;;  %s2843_s13 = smul.u32 384, %s3053_s9 }
 0x37d   : > { %v1326_v63 = vstv %s1325_s12  ;;  %s2985_s12 = smov 19  }
 0x37e   : > { %2900 = vrsqrt.f32 %v1326_v63 }
 0x388   : > { %v2901_v2 = vpop.eup %2900 }
 0x389   : > { %2835 = vpush %v2901_v2 }
 0x3ba   : > { %s2836_s19 = spop %2835 }
 0x3bb   : > { %v1329_v3 = vstv %s2836_s19  ;;  %s3428_s19 = scalar_lea.hbm %s3479_s8, %s2843_s13 }
 0x3bc   : > { %v1330_v5 = vmul.f32 %v1329_v3, %v1301_v42  ;;  %v1331_v6 = vmul.f32 %v1329_v3, %v1302_v43  ;;  %v1332_v7 = vmul.f32 %v1329_v3, %v1303_v44 }
 0x3be   : > { %v1339_v9 = vmul.f32 %v1337_v4, %v1330_v5  ;;  %v1340_v10 = vmul.f32 %v1337_v4, %v1331_v6  ;;  %v1341_v11 = vmul.f32 %v1337_v4, %v1332_v7  ;;  %v2526_v7 = vld [vmem:[%s3475_s4 + $0x8] sm:$0xf] }
 0x3c0   : > { %v1348_v12 = vadd.f32 %v1346_v8, %v1339_v9  ;;  %v1349_v13 = vadd.f32 %v1346_v8, %v1340_v10  ;;  %v1350_v14 = vadd.f32 %v1346_v8, %v1341_v11 }
 0x3c2   : > { %v1354_v15 = vmul.f32 0.70710677, %v1348_v12  ;;  %v1355_v16 = vmul.f32 0.70710677, %v1349_v13  ;;  %v1356_v17 = vmul.f32 0.70710677, %v1350_v14 }
 0x3c3   : > { %v1352_v24 = vmul.f32 0.5, %v1349_v13  ;;  %v1353_v26 = vmul.f32 0.5, %v1350_v14  ;;  %v1351_v31 = vmul.f32 0.5, %v1348_v12 }
 0x3c4   : > { %2902 = verf.f32 %v1354_v15  ;;  %v2530_v15 = vld [vmem:[%s3475_s4 + $0xc] sm:$0xf] }
 0x3c5   : > { %2904 = verf.f32 %v1355_v16 }
 0x3c6   : > { %2906 = verf.f32 %v1356_v17 }
 0x3ce   : > { %v2903_v18 = vpop.eup %2902 }
 0x3cf   : > { %v2905_v19 = vpop.eup %2904  ;;  %v1360_v29 = vadd.f32 1.0, %v2903_v18 }
 0x3d0   : > { %v2907_v21 = vpop.eup %2906  ;;  %v1361_v25 = vadd.f32 1.0, %v2905_v19 }
 0x3d1   : > { %v1362_v27 = vadd.f32 1.0, %v2907_v21  ;;  %v1363_v35 = vmul.f32 %v1360_v29, %v1351_v31 }
 0x3d2   : > { %v1364_v28 = vmul.f32 %v1361_v25, %v1352_v24 }
 0x3d3   : > { %v1365_v30 = vmul.f32 %v1362_v27, %v1353_v26  ;;  %v1366_v37 = vmul.f32 %v1363_v35, %v3244_v22  ;;  %v2534_v26 = vld [vmem:[%s3475_s4 + $0x10] sm:$0xf] }
 0x3d4   : > { %v1367_v32 = vmul.f32 %v1364_v28, %v3246_v23 }
 0x3d5   : > { %v1368_v34 = vmul.f32 %v1365_v30, %v3242_v20  ;;  %v1369_v38 = vpack.c.bf16 %v1366_v37, %v1366_v37 }
 0x3d6   : > { %v1370_v33 = vpack.c.bf16 %v1367_v32, %v1367_v32 }
 0x3d7   : > { %v1371_v36 = vpack.c.bf16 %v1368_v34, %v1368_v34  ;;  %v2538_v34 = vld [vmem:[%s3475_s4 + $0x14] sm:$0xf] }
 0x3d8   : > { %1377 = vrot.lane.b32.xlu1 %v1370_v33, %s2985_s12 }
 0x3dc   : > { %1379 = vrot.lane.b32.xlu1 %v1371_v36, %s2985_s12 }
 0x3e0   : > { %1375 = vrot.lane.b32.xlu1 %v1369_v38, %s2985_s12 }
 0x44a   : > { %v1378_v39 = vpop.permute.xlu1 %1377 }
 0x44e   : > { %v1380_v40 = vpop.permute.xlu1 %1379 }
 0x44f   : > { %v1383_v43 = vsel %vm1381_vm12, %v1378_v39, %v1380_v40 }
 0x450   : > { %v1390_v44 = vsel %vm1388_vm13, %v1383_v43, 0 }
 0x451   : > { %v1505_v56 = vsel %vm332_vm1, %v1390_v44, 0 }
 0x452   : > { %v1376_v41 = vpop.permute.xlu1 %1375 }
 0x453   : > { %v1387_v42 = vsel %vm1381_vm12, 0, %v1376_v41  ;;  %v1382_v45 = vsel %vm1381_vm12, %v1376_v41, %v1378_v39 }
 0x454   : > { %1590 = vrot.lane.b32.xlu0 %v1387_v42, %s2978_s23  ;;  %1396 = vrot.lane.b32.xlu1 %v1387_v42, %s2977_s22  ;;  %v1500_v58 = vsel %vm332_vm1, %v1387_v42, 0 }
 0x458   : > { %1594 = vrot.lane.b32.xlu0 %v1390_v44, %s2978_s23  ;;  %1398 = vrot.lane.b32.xlu1 %v1382_v45, %s2977_s22 }
 0x45c   : > { %1698 = vrot.lane.b32.xlu0 %v1382_v45, %s2979_s24  ;;  %1400 = vrot.lane.b32.xlu1 %v1390_v44, %s2977_s22  ;;  %s3486_s22 = smov 91  }
 0x460   : > { %1802 = vrot.lane.b32.xlu0 %v1387_v42, %s2980_s25  ;;  %1592 = vrot.lane.b32.xlu1 %v1382_v45, %s2978_s23  ;;  %s3487_s23 = smov 90  }
 0x464   : > { %1806 = vrot.lane.b32.xlu0 %v1390_v44, %s2980_s25  ;;  %1696 = vrot.lane.b32.xlu1 %v1387_v42, %s2979_s24 }
 0x468   : > { %1910 = vrot.lane.b32.xlu0 %v1382_v45, %s2981_s26  ;;  %1700 = vrot.lane.b32.xlu1 %v1390_v44, %s2979_s24 }
 0x46c   : > { %2014 = vrot.lane.b32.xlu0 %v1387_v42, %s2982_s10  ;;  %1804 = vrot.lane.b32.xlu1 %v1382_v45, %s2980_s25  ;;  %s296_s25 = sand.u32 1, %s2964_s28  }
 0x46d   : > { %s2403_s9 = scalar_lea.sflag [#allocation3], %s296_s25 }
 0x470   : > { %2018 = vrot.lane.b32.xlu0 %v1390_v44, %s2982_s10  ;;  %1908 = vrot.lane.b32.xlu1 %v1387_v42, %s2981_s26 }
 0x474   : > { %2122 = vrot.lane.b32.xlu0 %v1382_v45, %s3486_s22  ;;  %1912 = vrot.lane.b32.xlu1 %v1390_v44, %s2981_s26  ;;  %s2829_s26 = smul.u32 24, %s296_s25 }
 0x476   : > { %s298_s20 = scalar_lea.vmem [#allocation2], %s2829_s26 }
 0x477   : > { %s2417_s21 = sshll.u32 %s298_s20, 4  ;;  %s3430_s21 = int_to_ptr.vmem [resolvable:$true] %s2417_s21 }
 0x478   : > { %2226 = vrot.lane.b32.xlu0 %v1387_v42, %s3487_s23  ;;  %2016 = vrot.lane.b32.xlu1 %v1382_v45, %s2982_s10  ;;  %s2910_s12 = scalar_lea.vmem %s3430_s21, 384 }
 0x479   : > { %p2911_p11 = scmp.ne.s32.totalorder %s3430_s21, %s2910_s12 }
 0x47b   : > { %p2912_p12 = pnand %p2911_p11, %p3070_p5 }
 0x47c   : > { %2230 = vrot.lane.b32.xlu0 %v1390_v44, %s3487_s23  ;;  %2120 = vrot.lane.b32.xlu1 %v1387_v42, %s3486_s22  ;;  %v2542_v42 = vld [vmem:[%s3475_s4 + $0x18] sm:$0xf] }
 0x47d   : > { %p2913_p13 = pneg %p2912_p12 }
 0x480   : > { %2124 = vrot.lane.b32.xlu1 %v1390_v44, %s3486_s22 }
 0x484   : > { %2228 = vrot.lane.b32.xlu1 %v1382_v45, %s3487_s23 }
 0x4c6   : > { %v1397_v46 = vpop.permute.xlu1 %1396  ;;  %v1591_v49 = vpop.permute.xlu0 %1590 }
 0x4ca   : > { %v1399_v47 = vpop.permute.xlu1 %1398  ;;  %v1595_v57 = vpop.permute.xlu0 %1594 }
 0x4cb   : > { %v1402_v48 = vsel %vm325_vm3, %v1397_v46, %v1399_v47  ;;  %v1608_v2 = vsel %vm332_vm1, %v1595_v57, 0 }
 0x4cc   : > { %v1408_v53 = vsel %vm332_vm1, %v1402_v48, 0 }
 0x4ce   : > { %v1401_v50 = vpop.permute.xlu1 %1400  ;;  %v1699_v3 = vpop.permute.xlu0 %1698 }
 0x4cf   : > { %v1403_v51 = vsel %vm325_vm3, %v1399_v47, %v1401_v50  ;;  %v1414_v52 = vsel %vm332_vm1, %v1401_v50, 0 }
 0x4d0   : > { %2520 = vmatprep.subr.msk.bf16.mxu0 %vm332_vm1, %v1403_v51  ;;  %2648 = vmatpush3.bf16.msra.mxu1 %v1414_v52 }
 0x4d1   : > { %1417 = vmatpush1.bf16.msra.mxu0 %v1408_v53  ;;  %2653 = vmatprep.subr.bf16.mxu1 %v2974_v0  ;;  %v2550_v53 = vld [vmem:[%s3475_s4 + $0x20] sm:$0xf] }
 0x4d2   : > { %2523 = vmatprep.subr.msk.bf16.mxu0 %vm332_vm1, %v1382_v45  ;;  %v1593_v55 = vpop.permute.xlu1 %1592  ;;  %v1803_v6 = vpop.permute.xlu0 %1802 }
 0x4d3   : > { %2650 = vmatmul.mubr.msk.bf16.vlgmr.msra.gmra.mrb[4].mxu1 %vm328_vm2, %v2519_v54  ;;  %v1597_v59 = vsel %vm524_vm4, %v1593_v55, %v1595_v57  ;;  %v1596_v62 = vsel %vm524_vm4, %v1591_v49, %v1593_v55  ;;  %v2546_v49 = vld [vmem:[%s3475_s4 + $0x1c] sm:$0xf] }
 0x4d4   : > { %2521 = vmatmul.mubr.msk.bf16.vlgmr.msra.gmra.mrb[4].mxu0 %vm328_vm2, %v2519_v54  ;;  %2654 = vmatpush3.bf16.msra.mxu1 %v1505_v56  ;;  %v1602_v4 = vsel %vm332_vm1, %v1596_v62, 0 }
 0x4d5   : > { %1508 = vmatpush1.bf16.msra.mxu0 %v1500_v58  ;;  %2655 = vmatprep.mubr.msk.bf16.mxu1 %vm2975_vm0, %v2974_v0 }
 0x4d6   : > { %2527 = vmatprep.subr.msk.bf16.mxu0 %vm332_vm1, %v1597_v59  ;;  %2659 = vmatprep.subr.bf16.mxu1 %v2974_v0  ;;  %v1697_v60 = vpop.permute.xlu1 %1696  ;;  %v1807_v11 = vpop.permute.xlu0 %1806 }
 0x4d7   : > { %1539 = vmatprep.mubr.bf16.mxu0 %v2976_v1  ;;  %v1702_v8 = vsel %vm631_vm5, %v1697_v60, %v1699_v3  ;;  %v1820_v18 = vsel %vm332_vm1, %v1807_v11, 0 }
 0x4d8   : > { %v1708_v12 = vsel %vm332_vm1, %v1702_v8, 0 }
 0x4da   : > { %v1701_v63 = vpop.permute.xlu1 %1700  ;;  %v1911_v19 = vpop.permute.xlu0 %1910 }
 0x4db   : > { %v1703_v5 = vsel %vm631_vm5, %v1699_v3, %v1701_v63  ;;  %v1714_v10 = vsel %vm332_vm1, %v1701_v63, 0 }
 0x4de   : > { %v1805_v9 = vpop.permute.xlu1 %1804  ;;  %v2015_v25 = vpop.permute.xlu0 %2014 }
 0x4df   : > { %2656 = vmatmul.mubr.msk.bf16.vlgmr.msra.gmra.mrb[4].mxu1 %vm328_vm2, %v1391_v61  ;;  %v1809_v13 = vsel %vm738_vm6, %v1805_v9, %v1807_v11  ;;  %v1808_v16 = vsel %vm738_vm6, %v1803_v6, %v1805_v9 }
 0x4e0   : > { %2660 = vmatpush3.bf16.msra.mxu1 %v1608_v2  ;;  %2524 = vmatmul.mubr.msk.bf16.vlgmr.msra.gmra.mrb[4].mxu0 %vm328_vm2, %v1391_v61  ;;  %v1814_v21 = vsel %vm332_vm1, %v1808_v16, 0 }
 0x4e1   : > { %1611 = vmatpush1.bf16.msra.mxu0 %v1602_v4  ;;  %2661 = vmatprep.mubr.msk.bf16.mxu1 %vm2975_vm0, %v2974_v0  ;;  %v2390_v4 = vld [vmem:[%s3477_s6] sm:$0xff] }
 0x4e2   : > { %2531 = vmatprep.subr.msk.bf16.mxu0 %vm332_vm1, %v1703_v5  ;;  %2665 = vmatprep.subr.bf16.mxu1 %v2974_v0  ;;  %v1909_v14 = vpop.permute.xlu1 %1908  ;;  %v2019_v30 = vpop.permute.xlu0 %2018 }
 0x4e3   : > { %1642 = vmatprep.mubr.bf16.mxu0 %v2976_v1  ;;  %v1914_v27 = vsel %vm845_vm7, %v1909_v14, %v1911_v19  ;;  %v2032_v37 = vsel %vm332_vm1, %v2019_v30, 0 }
 0x4e4   : > { %v1920_v31 = vsel %vm332_vm1, %v1914_v27, 0 }
 0x4e6   : > { %v1913_v17 = vpop.permute.xlu1 %1912  ;;  %v2123_v38 = vpop.permute.xlu0 %2122 }
 0x4e7   : > { %v1915_v24 = vsel %vm845_vm7, %v1911_v19, %v1913_v17  ;;  %v1926_v29 = vsel %vm332_vm1, %v1913_v17, 0 }
 0x4ea   : > { %v2017_v28 = vpop.permute.xlu1 %2016  ;;  %v2227_v41 = vpop.permute.xlu0 %2226 }
 0x4eb   : > { %2662 = vmatmul.mubr.msk.bf16.vlgmr.msra.gmra.mrb[4].mxu1 %vm328_vm2, %v2526_v7  ;;  %v2021_v32 = vsel %vm952_vm8, %v2017_v28, %v2019_v30  ;;  %v2020_v35 = vsel %vm952_vm8, %v2015_v25, %v2017_v28  ;;  %v2381_v28 = vld [vmem:[%s3476_s5] sm:$0xff] }
 0x4ec   : > { %2666 = vmatpush3.bf16.msra.mxu1 %v1714_v10  ;;  %2528 = vmatmul.mubr.msk.bf16.vlgmr.msra.gmra.mrb[4].mxu0 %vm328_vm2, %v2526_v7  ;;  %v2026_v39 = vsel %vm332_vm1, %v2020_v35, 0 }
 0x4ed   : > { %1717 = vmatpush1.bf16.msra.mxu0 %v1708_v12  ;;  %2667 = vmatprep.mubr.msk.bf16.mxu1 %vm2975_vm0, %v2974_v0 }
 0x4ee   : > { %2535 = vmatprep.subr.msk.bf16.mxu0 %vm332_vm1, %v1809_v13  ;;  %2671 = vmatprep.subr.bf16.mxu1 %v2974_v0  ;;  %v2121_v33 = vpop.permute.xlu1 %2120  ;;  %v2231_v46 = vpop.permute.xlu0 %2230 }
 0x4ef   : > { %1748 = vmatprep.mubr.bf16.mxu0 %v2976_v1  ;;  %v2126_v43 = vsel %vm1059_vm9, %v2121_v33, %v2123_v38  ;;  %v2244_v51 = vsel %vm332_vm1, %v2231_v46, 0 }
 0x4f0   : > { %v2132_v47 = vsel %vm332_vm1, %v2126_v43, 0 }
 0x4f2   : > { %v2125_v36 = vpop.permute.xlu1 %2124 }
 0x4f3   : > { %v2127_v40 = vsel %vm1059_vm9, %v2123_v38, %v2125_v36  ;;  %v2138_v45 = vsel %vm332_vm1, %v2125_v36, 0 }
 0x4f6   : > { %v2229_v44 = vpop.permute.xlu1 %2228 }
 0x4f7   : > { %2668 = vmatmul.mubr.msk.bf16.vlgmr.msra.gmra.mrb[4].mxu1 %vm328_vm2, %v2530_v15  ;;  %v2233_v48 = vsel %vm1166_vm10, %v2229_v44, %v2231_v46  ;;  %v2232_v50 = vsel %vm1166_vm10, %v2227_v41, %v2229_v44 }
 0x4f8   : > { %2672 = vmatpush3.bf16.msra.mxu1 %v1820_v18  ;;  %2532 = vmatmul.mubr.msk.bf16.vlgmr.msra.gmra.mrb[4].mxu0 %vm328_vm2, %v2530_v15  ;;  %v2238_v52 = vsel %vm332_vm1, %v2232_v50, 0 }
 0x4f9   : > { %1823 = vmatpush1.bf16.msra.mxu0 %v1814_v21  ;;  %2673 = vmatprep.mubr.msk.bf16.mxu1 %vm2975_vm0, %v2974_v0 }
 0x4fa   : > { %2539 = vmatprep.subr.msk.bf16.mxu0 %vm332_vm1, %v1915_v24  ;;  %2677 = vmatprep.subr.bf16.mxu1 %v2974_v0 }
 0x4fb   : > { %1854 = vmatprep.mubr.bf16.mxu0 %v2976_v1 }
 0x503   : > { %2674 = vmatmul.mubr.msk.bf16.vlgmr.msra.gmra.mrb[4].mxu1 %vm328_vm2, %v2534_v26 }
 0x504   : > { %2678 = vmatpush3.bf16.msra.mxu1 %v1926_v29  ;;  %2536 = vmatmul.mubr.msk.bf16.vlgmr.msra.gmra.mrb[4].mxu0 %vm328_vm2, %v2534_v26 }
 0x505   : > { %1929 = vmatpush1.bf16.msra.mxu0 %v1920_v31  ;;  %2679 = vmatprep.mubr.msk.bf16.mxu1 %vm2975_vm0, %v2974_v0 }
 0x506   : > { %2543 = vmatprep.subr.msk.bf16.mxu0 %vm332_vm1, %v2021_v32  ;;  %2683 = vmatprep.subr.bf16.mxu1 %v2974_v0 }
 0x507   : > { %1960 = vmatprep.mubr.bf16.mxu0 %v2976_v1 }
 0x50f   : > { %2680 = vmatmul.mubr.msk.bf16.vlgmr.msra.gmra.mrb[4].mxu1 %vm328_vm2, %v2538_v34 }
 0x510   : > { %2684 = vmatpush3.bf16.msra.mxu1 %v2032_v37  ;;  %2540 = vmatmul.mubr.msk.bf16.vlgmr.msra.gmra.mrb[4].mxu0 %vm328_vm2, %v2538_v34 }
 0x511   : > { %2035 = vmatpush1.bf16.msra.mxu0 %v2026_v39  ;;  %2685 = vmatprep.mubr.msk.bf16.mxu1 %vm2975_vm0, %v2974_v0 }
 0x512   : > { %2547 = vmatprep.subr.msk.bf16.mxu0 %vm332_vm1, %v2127_v40  ;;  %2689 = vmatprep.subr.bf16.mxu1 %v2974_v0 }
 0x513   : > { %2066 = vmatprep.mubr.bf16.mxu0 %v2976_v1 }
 0x51b   : > { %2686 = vmatmul.mubr.msk.bf16.vlgmr.msra.gmra.mrb[4].mxu1 %vm328_vm2, %v2542_v42 }
 0x51c   : > { %2690 = vmatpush3.bf16.msra.mxu1 %v2138_v45  ;;  %2544 = vmatmul.mubr.msk.bf16.vlgmr.msra.gmra.mrb[4].mxu0 %vm328_vm2, %v2542_v42 }
 0x51d   : > { %2141 = vmatpush1.bf16.msra.mxu0 %v2132_v47  ;;  %2691 = vmatprep.mubr.msk.bf16.mxu1 %vm2975_vm0, %v2974_v0 }
 0x51e   : > { %2551 = vmatprep.subr.msk.bf16.mxu0 %vm332_vm1, %v2233_v48  ;;  %2695 = vmatprep.subr.bf16.mxu1 %v2974_v0 }
 0x51f   : > { %2172 = vmatprep.mubr.bf16.mxu0 %v2976_v1 }
 0x527   : > { %2692 = vmatmul.mubr.msk.bf16.vlgmr.msra.gmra.mrb[4].mxu1 %vm328_vm2, %v2546_v49 }
 0x528   : > { %2696 = vmatpush3.bf16.msra.mxu1 %v2244_v51  ;;  %2548 = vmatmul.mubr.msk.bf16.vlgmr.msra.gmra.mrb[4].mxu0 %vm328_vm2, %v2546_v49 }
 0x529   : > { %2247 = vmatpush1.bf16.msra.mxu0 %v2238_v52  ;;  %2697 = vmatprep.mubr.msk.bf16.mxu1 %vm2975_vm0, %v2974_v0 }
 0x52a   : > { %2278 = vmatprep.mubr.bf16.mxu0 %v2976_v1 }
 0x533   : > { %2698 = vmatmul.mubr.msk.bf16.vlgmr.msra.gmra.mrb[4].mxu1 %vm328_vm2, %v2550_v53 }
 0x534   : > { %2552 = vmatmul.mubr.msk.bf16.vlgmr.msra.gmra.mrb[4].mxu0 %vm328_vm2, %v2550_v53 }
 0x606   : > { %v2321_v54 = vpop.f32.mrb[4].mxu1 }
 0x607   : > { %v2280_v55 = vpop.f32.mrb[4].mxu0  ;;  %v2699_v56 = vpop.f32.mrb[5].mxu1  ;;  %v2332_v57 = vmul.f32 %v2321_v54, %v3242_v20 }
 0x608   : > { %v2330_v58 = vmul.f32 %v2280_v55, %v3244_v22  ;;  %v2282_v59 = vpop.f32.mrb[5].mxu0  ;;  %v2324_v60 = vpop.f32.mrb[6].mxu1 }
 0x609   : > { %v2331_v0 = vmul.f32 %v2282_v59, %v3246_v23  ;;  %v2284_v1 = vpop.f32.mrb[6].mxu0  ;;  %v2700_v61 = vpop.f32.mrb[7].mxu1  ;;  %v2334_v2 = vsel %vm1285_vm11, %v2332_v57, 0.0 }
 0x60a   : > { %v2285_v62 = vpop.f32.mrb[7].mxu0 }
 0x60b   : > { %v2333_v63 = vadd.f32 %v2331_v0, %v2330_v58 }
 0x60d   : > { %v2335_v3 = vadd.f32 %v2334_v2, %v2333_v63 }
 0x60f   : > { %2336 = vadd.xlane.f32.xlu1 %v2335_v3 }
 0x620   : > { %2393 = vperm.xlu1 %2896, %v2390_v4  }
 0x69c   : > { %v2337_v5 = vpop.xlane.xlu1 %2336 }
 0x69d   : > { %v2338_v6 = vrot.slane %v2337_v5, 4 }
 0x69f   : > { %v2339_v7 = vadd.f32 %v2338_v6, %v2337_v5 }
 0x6a0   : > { %v2394_v43 = vpop.permute.xlu1 %2393 }
 0x6a1   : > { %v2340_v8 = vrot.slane %v2339_v7, 2 }
 0x6a3   : > { %v2341_v9 = vadd.f32 %v2340_v8, %v2339_v7 }
 0x6a5   : > { %v2342_v10 = vrot.slane %v2341_v9, 1 }
 0x6a7   : > { %v2343_v11 = vadd.f32 %v2342_v10, %v2341_v9 }
 0x6a9   : > { %2837 = vpush %v2343_v11 }
 0x6da   : > { %s2838_s17 = spop %2837 }
 0x6db   : > { %s2347_s18 = smul.f32 0.00048828125, %s2838_s17 }
 0x6dd   : > { %v2348_v12 = vstv %s2347_s18 }
 0x6de   : > { %v2349_v13 = vsub.f32 %v2280_v55, %v2348_v12  ;;  %v2350_v14 = vsub.f32 %v2282_v59, %v2348_v12  ;;  %v2351_v15 = vsub.f32 %v2321_v54, %v2348_v12 }
 0x6e0   : > { %v2352_v16 = vmul.f32 %v2349_v13, %v3244_v22  ;;  %v2353_v17 = vmul.f32 %v2350_v14, %v3246_v23  ;;  %v2354_v18 = vmul.f32 %v2351_v15, %v3242_v20 }
 0x6e2   : > { %v2355_v19 = vmul.f32 %v2352_v16, %v2352_v16  ;;  %v2356_v21 = vmul.f32 %v2353_v17, %v2353_v17  ;;  %v2357_v24 = vmul.f32 %v2354_v18, %v2354_v18 }
 0x6e4   : > { %v2358_v25 = vadd.f32 %v2356_v21, %v2355_v19  ;;  %v2359_v26 = vsel %vm1285_vm11, %v2357_v24, 0.0 }
 0x6e6   : > { %v2360_v27 = vadd.f32 %v2359_v26, %v2358_v25 }
 0x6e8   : > { %2361 = vadd.xlane.f32.xlu0 %v2360_v27 }
 0x6fe   : > { %2384 = vperm.xlu0 %2895, %v2381_v28  }
 0x775   : > { %v2362_v29 = vpop.xlane.xlu0 %2361 }
 0x776   : > { %v2363_v22 = vrot.slane %v2362_v29, 4 }
 0x778   : > { %v2364_v30 = vadd.f32 %v2363_v22, %v2362_v29 }
 0x77a   : > { %v2365_v23 = vrot.slane %v2364_v30, 2 }
 0x77c   : > { %v2366_v31 = vadd.f32 %v2365_v23, %v2364_v30 }
 0x77d   : > { %v2385_v39 = vpop.permute.xlu0 %2384 }
 0x77e   : > { %v2367_v20 = vrot.slane %v2366_v31, 1 }
 0x780   : > { %v2368_v32 = vadd.f32 %v2367_v20, %v2366_v31 }
 0x782   : > { %2839 = vpush %v2368_v32 }
 0x7b3   : > { %s2840_s22 = spop %2839 }
 0x7b4   : > { %s2372_s23 = smul.f32 0.00048828125, %s2840_s22  ;;  %s2986_s22 = smov [#allocation2]  }
 0x7b6   : > { %s2373_s24 = sadd.f32 1e-05, %s2372_s23  ;;  %s2914_s23 = sshll.u32 %s2986_s22, 4  ;;  %s2915_s23 = int_to_ptr.vmem [resolvable:$false] %s2914_s23 }
 0x7b7   : > { %p2917_p0 = scmp.lt.s32.totalorder %s3430_s21, %s2915_s23 }
 0x7b8   : > { %v2374_v33 = vstv %s2373_s24  ;;  %s2916_s24 = scalar_lea.vmem %s2915_s23, 768 }
 0x7b9   : > { %2908 = vrsqrt.f32 %v2374_v33  ;;  %p2918_p1 = scmp.lt.s32.totalorder %s2916_s24, %s2910_s12 }
 0x7bb   : > { %p2919_p2 = por %p2918_p1, %p2917_p0 }
 0x7bd   : > { %p2920_p3 = pnand %p2919_p2, %p2913_p13 }
 0x7c3   : > { %v2909_v34 = vpop.eup %2908 }
 0x7c4   : > { %2841 = vpush %v2909_v34 }
 0x7f5   : > { %s2842_s10 = spop %2841 }
 0x7f6   : > { %v2377_v35 = vstv %s2842_s10 }
 0x7f7   : > { %v2378_v36 = vmul.f32 %v2377_v35, %v2349_v13  ;;  %v2379_v37 = vmul.f32 %v2377_v35, %v2350_v14  ;;  %v2380_v38 = vmul.f32 %v2377_v35, %v2351_v15 }
 0x7f9   : > { %v2387_v40 = vmul.f32 %v2385_v39, %v2378_v36  ;;  %v2388_v41 = vmul.f32 %v2385_v39, %v2379_v37  ;;  %v2389_v42 = vmul.f32 %v2385_v39, %v2380_v38 }
 0x7fb   : > { %v2396_v44 = vadd.f32 %v2394_v43, %v2387_v40  ;;  %v2397_v45 = vadd.f32 %v2394_v43, %v2388_v41  ;;  %v2398_v46 = vadd.f32 %v2394_v43, %v2389_v42 }
 0x7fd   : > { %2399 = vst [vmem:[%s298_s20] sm:$0xff] %v2396_v44  ;;  %2400 = vst [vmem:[%s298_s20 + $0x8] sm:$0xff] %v2397_v45 }
 0x7fe   : > { %2401 = vst.msk [vmem:[%s298_s20 + $0x10] sm:$0xff] %vm1285_vm11, %v2398_v46 }
 0x7ff   : > { %2923 = shalt.err (!%p2920_p3)
}
 0x800   : > { %s2924_s25 = scalar_lea.hbm %s3428_s19, 384  ;;  %s2928_s13 = scalar_lea.hbm %s3479_s8, 768 }
 0x801   : > { %p2925_p4 = scmp.ne.s32.totalorder %s3428_s19, %s2924_s25  ;;  %p2929_p9 = scmp.lt.u32.totalorder %s3428_s19, %s3479_s8 }
 0x802   : > { %p2930_p10 = scmp.lt.u32.totalorder %s2928_s13, %s2924_s25  ;;  %p2932_p12 = scmp.lt.u32.totalorder %s2924_s25, %s3428_s19 }
 0x803   : > { %p2926_p7 = pnand %p2925_p4, %p3070_p5 }
 0x804   : > { %p2931_p11 = por %p2930_p10, %p2929_p9 }
 0x805   : > { %p2927_p8 = pneg %p2926_p7 }
 0x806   : > { %p2933_p13 = por %p2932_p12, %p2931_p11 }
 0x808   : > { %p2934_p0 = pnand %p2933_p13, %p2927_p8 }
 0x80a   : > { %2937 = shalt.err (!%p2934_p0)
}
 0x80b   : > { %2844 = dma.vmem_to_hbm [thread:$0]  (%p3070_p5), %s3430_s21, 384, %s3428_s19, %s2403_s9  }
 0x80c PF: > { %p2850_p1 = scmp.ge.s32.totalorder %s2972_s30, 2  ;;  %s2429_s18 = sand.u32 1, %s2960_s27  }
 0x80d   : > { %s2430_s12 = scalar_lea.sflag [#allocation3], %s2429_s18 }
 0x80e   : > { %p2847_p2 = pnand %p2850_p1, %p3074_p6 }
 0x810   : > { %2955 = dma.done.wait (!%p2847_p2), %s2430_s12, 384  }
 0x811   : > { %2957 = vsyncadd (!%p2847_p2), %s2430_s12, 4294966912  ;;  %p18_p3 = scmp.ge.s32.totalorder %s3057_s11, 4   ;;  %s3488_s27 = smov %s2964_s28 }
 0x812   : > { %s3489_s28 = smov %s2968_s29  ;;  %s3490_s29 = smov %s3068_s14 }
 0x813   : > { %s3491_s30 = smov %s3057_s11  ;;  %20 = sbr.rel (!%p18_p3) target bundleno = 3 (0x3), region = 103 }
 0x81a   :  { %2435 = vsyncpa [#allocation3], 1 }
 0x81b   :  { %2437 = vsyncpa [#allocation3 + $0x1], 1 }

</bundles_post_ra>
